<compile_context>
chip_gen: v5e
topology: v5e:2x2
jax: 0.10.0
libtpu: 0.0.40
codegen_flags: <defaults>
</compile_context>

<pallas_src>
import functools

import jax
import jax.numpy as jnp
from jax.experimental import pallas as pl
from jax.experimental.pallas import tpu as pltpu


LANE = 128
MIB = 1024 * 1024


def _round_up(x, m):
    return (x + m - 1) // m * m


def _pad2d(x, rows, cols):
    r, c = x.shape
    return jnp.pad(x, ((0, rows - r), (0, cols - c)))


def _vmem_capacity_bytes():
    """Physical VMEM of the attached TPU generation (fallback: v7x's 64 MiB)."""
    try:
        info = pltpu.get_tpu_info()
        cap = getattr(info, "vmem_capacity_bytes", None)
        if cap:
            return int(cap)
    except Exception:
        pass
    return 64 * MIB


_VMEM_CAP = _vmem_capacity_bytes()
# Scoped limit ~75% of physical: 96 MiB on v5e/v6e (128 MiB), 48 MiB on v7x (64 MiB).
_VMEM_LIMIT = min(int(_VMEM_CAP * 0.75), 112 * MIB)
# Budget used for tile sizing (leave headroom for compiler-internal scratch).
_TILE_BUDGET = min(int(_VMEM_CAP * 0.5), 56 * MIB)


# ---------------------------------------------------------------------------
# Tile selection
# ---------------------------------------------------------------------------
def _pick_tm(n_p):
    # Keep >= 2 row tiles whenever possible so the 'parallel' axis feeds both
    # TensorCores on v7x.
    for t in (512, 256, 128):
        if n_p % t == 0 and n_p // t >= 2:
            return t
    return min(n_p, LANE)


def _layer_vmem_bytes(tm, tk, n_p, acc_cols, h_p, f_p, fuse_weight,
                      x_resident, out_bytes):
    a_bytes = 2 * tm * tk * 2                       # double-buffered bf16 A tile
    x_rows = n_p if x_resident else tk
    x_bytes = 2 * x_rows * acc_cols * 2             # X (or XW) bf16
    w_bytes = (2 * f_p * h_p * 2) if fuse_weight else 0
    b_bytes = 2 * h_p * 4
    acc_bytes = tm * acc_cols * 4                   # f32 accumulator
    out_b = 2 * tm * h_p * out_bytes
    return a_bytes + x_bytes + w_bytes + b_bytes + acc_bytes + out_b


def _pick_layer_tiles(n_p, acc_cols, h_p, f_p, fuse_weight, out_bytes, budget):
    tm = _pick_tm(n_p)
    m = n_p // LANE
    divisors = [d for d in range(m, 0, -1) if m % d == 0]
    # Prefer a fully resident X; within that, the largest tk that fits VMEM.
    for x_resident in (True, False):
        for d in divisors:
            tk = d * LANE
            if _layer_vmem_bytes(tm, tk, n_p, acc_cols, h_p, f_p,
                                 fuse_weight, x_resident, out_bytes) <= budget:
                return tm, tk, x_resident
    return tm, LANE, False


# ---------------------------------------------------------------------------
# Pallas kernels
# ---------------------------------------------------------------------------
def gcn_propagate_kernel(a_ref, x_ref, *rest, apply_relu, fuse_weight,
                         x_resident, tk):
    """One GCN layer row-tile: out = act(A_hat @ Y [@ W] + b).

    grid = (row tiles i, source-node tiles k); k is the reduction axis.
    acc accumulates (A_hat @ Y) in f32; weight / bias / activation applied on
    the last k step only.
    """
    if fuse_weight:
        w_ref, b_ref, out_ref, acc_ref = rest
    else:
        b_ref, out_ref, acc_ref = rest
        w_ref = None

    k = pl.program_id(1)

    @pl.when(k == 0)
    def _():
        acc_ref[...] = jnp.zeros_like(acc_ref)

    if x_resident:
        # X kept fully resident in VMEM; slice the rows matching this k tile.
        start = pl.multiple_of(k * tk, tk)
        x_blk = x_ref[pl.ds(start, tk), :]
    else:
        x_blk = x_ref[...]

    # bf16 operands on the MXU, f32 accumulation.
    acc_ref[...] += jnp.dot(a_ref[...], x_blk,
                            preferred_element_type=jnp.float32)

    @pl.when(k == pl.num_programs(1) - 1)
    def _():
        z = acc_ref[...]
        if fuse_weight:
            z = jnp.dot(z.astype(w_ref.dtype), w_ref[...],
                        preferred_element_type=jnp.float32)
        z = z + b_ref[...]
        if apply_relu:
            z = jnp.maximum(z, 0.0)
        out_ref[...] = z.astype(out_ref.dtype)


def xw_kernel(x_ref, w_ref, out_ref):
    """Row-tiled feature transform X @ W (used when F > H: A @ (X @ W) order)."""
    out_ref[...] = jnp.dot(x_ref[...], w_ref[...],
                           preferred_element_type=jnp.float32).astype(out_ref.dtype)


# ---------------------------------------------------------------------------
# Per-layer wrapper
# ---------------------------------------------------------------------------
def gcn_layer(a_hat, x, w, b, *, fuse_weight, apply_relu, out_dtype):
    """out = act(A_hat @ X @ W + b). Operands already lane-padded / bf16."""
    n_p = a_hat.shape[0]
    f_p, h_p = w.shape

    if not fuse_weight:
        # F > H (e.g. Cora's raw features): transform first, then propagate.
        tm_x = _pick_tm(n_p)
        x = pl.pallas_call(
            xw_kernel,
            out_shape=jax.ShapeDtypeStruct((n_p, h_p), jnp.bfloat16),
            grid_spec=pltpu.PrefetchScalarGridSpec(
                num_scalar_prefetch=0,
                grid=(n_p // tm_x,),
                in_specs=[pl.BlockSpec((tm_x, f_p), lambda i: (i, 0)),
                          pl.BlockSpec((f_p, h_p), lambda i: (0, 0))],
                out_specs=pl.BlockSpec((tm_x, h_p), lambda i: (i, 0)),
            ),
            compiler_params=pltpu.CompilerParams(
                dimension_semantics=("parallel",),
                vmem_limit_bytes=_VMEM_LIMIT),
        )(x, w)

    acc_cols = f_p if fuse_weight else h_p
    out_bytes = jnp.dtype(out_dtype).itemsize
    tm, tk, x_resident = _pick_layer_tiles(
        n_p, acc_cols, h_p, f_p, fuse_weight, out_bytes, _TILE_BUDGET)

    in_specs = [pl.BlockSpec((tm, tk), lambda i, k: (i, k))]        # A_hat tile
    if x_resident:
        in_specs.append(pl.BlockSpec((n_p, acc_cols), lambda i, k: (0, 0)))
    else:
        in_specs.append(pl.BlockSpec((tk, acc_cols), lambda i, k: (k, 0)))
    args = [a_hat, x]
    if fuse_weight:
        in_specs.append(pl.BlockSpec((f_p, h_p), lambda i, k: (0, 0)))  # W resident
        args.append(w)
    in_specs.append(pl.BlockSpec((1, h_p), lambda i, k: (0, 0)))        # bias resident
    args.append(b)

    kernel = functools.partial(
        gcn_propagate_kernel,
        apply_relu=apply_relu, fuse_weight=fuse_weight,
        x_resident=x_resident, tk=tk)

    return pl.pallas_call(
        kernel,
        out_shape=jax.ShapeDtypeStruct((n_p, h_p), out_dtype),
        grid_spec=pltpu.PrefetchScalarGridSpec(
            num_scalar_prefetch=0,
            grid=(n_p // tm, n_p // tk),
            in_specs=in_specs,
            out_specs=pl.BlockSpec((tm, h_p), lambda i, k: (i, 0)),
            scratch_shapes=[pltpu.VMEM((tm, acc_cols), jnp.float32)],
        ),
        compiler_params=pltpu.CompilerParams(
            dimension_semantics=("parallel", "arbitrary"),
            vmem_limit_bytes=_VMEM_LIMIT),
    )(*args)


# ---------------------------------------------------------------------------
# Full Generator forward (two GCN layers)
# ---------------------------------------------------------------------------
@jax.jit
def generator_forward(a_hat_padded, x, w1, b1, w2, b2):
    """a_hat_padded: (n_p, n_p) bf16, zero-padded normalized adjacency."""
    n, f_in = x.shape
    hidden = w1.shape[1]
    n_p = a_hat_padded.shape[0]
    f_p = _round_up(f_in, LANE)
    h_p = _round_up(hidden, LANE)

    a_p = a_hat_padded.astype(jnp.bfloat16)
    x_p = _pad2d(x, n_p, f_p).astype(jnp.bfloat16)
    w1_p = _pad2d(w1, f_p, h_p).astype(jnp.bfloat16)
    w2_p = _pad2d(w2, h_p, h_p).astype(jnp.bfloat16)
    b1_p = jnp.pad(b1, (0, h_p - hidden)).reshape(1, h_p).astype(jnp.float32)
    b2_p = jnp.pad(b2, (0, h_p - hidden)).reshape(1, h_p).astype(jnp.float32)

    # Contraction order decided from the TRUE dims (dominant term N^2*min(F,H)).
    fuse1 = f_in <= hidden

    # Layer 1: H = relu(A_hat @ X @ W1 + b1)   (bf16 intermediate, halves HBM)
    h = gcn_layer(a_p, x_p, w1_p, b1_p, fuse_weight=fuse1,
                  apply_relu=True, out_dtype=jnp.bfloat16)
    # Layer 2: Z = A_hat @ H @ W2 + b2
    z = gcn_layer(a_p, h, w2_p, b2_p, fuse_weight=True,
                  apply_relu=False, out_dtype=jnp.float32)
    return z[:n, :hidden]


# ---------------------------------------------------------------------------
# Glue: dense normalized adjacency from edge_index (plain JAX)
# ---------------------------------------------------------------------------
def build_norm_adj(edge_index, num_nodes, padded_nodes):
    """A_hat built directly zero-padded to (padded_nodes, padded_nodes), bf16."""
    # TODO(synk): for real sparse graphs, replace this dense N x N A_hat with a
    # scalar-prefetch (PrefetchScalarGridSpec) block-sparse formulation so HBM
    # bytes and MXU FLOPs scale with edges, not N^2; an int8 (v5e/v6e) / fp8
    # (v7x) A_hat with per-row scales would further halve the dominant stream.
    src = edge_index[0]
    dst = edge_index[1]
    loop = jnp.arange(num_nodes, dtype=src.dtype)
    src = jnp.concatenate([src, loop])
    dst = jnp.concatenate([dst, loop])
    w = jnp.ones(src.shape[0], jnp.float32)
    deg = jnp.zeros((num_nodes,), jnp.float32).at[dst].add(w)
    dinv = jnp.where(deg > 0, 1.0 / jnp.sqrt(deg), 0.0)
    norm = dinv[src] * w * dinv[dst]
    # A_hat[target, source] = norm  (aggregation at target node)
    a_hat = jnp.zeros((padded_nodes, padded_nodes), jnp.bfloat16)
    a_hat = a_hat.at[dst, src].add(norm.astype(jnp.bfloat16))
    return a_hat


def reference_forward(a_hat_bf, x, w1, b1, w2, b2):
    """Plain-JAX mirror of the kernel numerics (bf16 operands, f32 accumulation),
    including the data-dependent contraction order."""
    f_in = x.shape[1]
    hidden = w1.shape[1]

    def layer(y_bf, w, b, relu, fuse):
        w_bf = w.astype(jnp.bfloat16)
        if fuse:
            ay = jnp.dot(a_hat_bf, y_bf, preferred_element_type=jnp.float32)
            z = jnp.dot(ay.astype(jnp.bfloat16), w_bf,
                        preferred_element_type=jnp.float32)
        else:
            yw = jnp.dot(y_bf, w_bf,
                         preferred_element_type=jnp.float32).astype(jnp.bfloat16)
            z = jnp.dot(a_hat_bf, yw, preferred_element_type=jnp.float32)
        z = z + b
        return jnp.maximum(z, 0.0) if relu else z

    h = layer(x.astype(jnp.bfloat16), w1, b1, True, f_in <= hidden)
    return layer(h.astype(jnp.bfloat16), w2, b2, False, True)


if __name__ == "__main__":
    def run_case(num_nodes, num_features, hidden, num_edges):
        key = jax.random.PRNGKey(0)
        k_x, k_e, k_w1, k_w2 = jax.random.split(key, 4)

        x = jax.random.normal(k_x, (num_nodes, num_features), dtype=jnp.float32)
        edge_index = jax.random.randint(k_e, (2, num_edges), 0, num_nodes,
                                        dtype=jnp.int32)

        def glorot(k, shape):
            limit = (6.0 / (shape[0] + shape[1])) ** 0.5
            return jax.random.uniform(k, shape, jnp.float32, -limit, limit)

        w1 = glorot(k_w1, (num_features, hidden))
        b1 = jnp.zeros((hidden,), jnp.float32)
        w2 = glorot(k_w2, (hidden, hidden))
        b2 = jnp.zeros((hidden,), jnp.float32)

        n_p = _round_up(num_nodes, LANE)
        a_hat_p = build_norm_adj(edge_index, num_nodes, n_p)

        z = jax.block_until_ready(generator_forward(a_hat_p, x, w1, b1, w2, b2))
        assert z.shape == (num_nodes, hidden)

        z_ref = reference_forward(a_hat_p[:num_nodes, :num_nodes],
                                  x, w1, b1, w2, b2)
        err = float(jnp.max(jnp.abs(z - z_ref)))
        assert jnp.allclose(z, z_ref, atol=2e-2, rtol=2e-2), err

    # Fused-weight path (F <= H): A @ X first, weight applied in the epilogue.
    run_case(num_nodes=512, num_features=16, hidden=32, num_edges=2048)
    # Feature-transform-first path (F > H) with non-128-multiple shapes.
    run_case(num_nodes=300, num_features=200, hidden=64, num_edges=1500)

    print("KERNEL_OK")
</pallas_src>

<mosaic_0001>
module attributes {stable_mosaic.version = 11 : i64} {
  func.func @gcn_propagate_kernel(%arg0: i32, %arg1: i32, %arg2: memref<256x512xbf16, #tpu.memory_space<vmem>>, %arg3: memref<512x128xbf16, #tpu.memory_space<vmem>>, %arg4: memref<128x128xbf16, #tpu.memory_space<vmem>>, %arg5: memref<1x128xf32, #tpu.memory_space<vmem>>, %arg6: memref<256x128xbf16, #tpu.memory_space<vmem>>, %arg7: memref<256x128xf32, #tpu.memory_space<vmem>>) attributes {dimension_semantics = [#tpu.dimension_semantics<parallel>, #tpu.dimension_semantics<arbitrary>], iteration_bounds = array<i64: 2, 1>, scalar_prefetch = 0 : i64, scratch_operands = 1 : i64, tpu.core_type = #tpu.core_type<tc>, window_params = [{transform_indices = @transform_0, window_bounds = array<i64: 256, 512>}, {pipeline_mode = #tpu.pipeline_mode<synchronous>, transform_indices = @transform_1, window_bounds = array<i64: 512, 128>}, {pipeline_mode = #tpu.pipeline_mode<synchronous>, transform_indices = @transform_2, window_bounds = array<i64: 128, 128>}, {pipeline_mode = #tpu.pipeline_mode<synchronous>, transform_indices = @transform_3, window_bounds = array<i64: 1, 128>}, {transform_indices = @transform_4, window_bounds = array<i64: 256, 128>}]} {
    %c0_i32 = arith.constant 0 : i32
    %0 = arith.cmpi eq, %arg1, %c0_i32 : i32
    %1 = arith.extui %0 : i1 to i32
    %c0_i32_0 = arith.constant 0 : i32
    %2 = arith.cmpi ne, %1, %c0_i32_0 : i32
    scf.if %2 {
      %cst_9 = arith.constant 0.000000e+00 : f32
      %15 = vector.broadcast %cst_9 : f32 to vector<256x128xf32>
      %c0_10 = arith.constant 0 : index
      %c0_11 = arith.constant 0 : index
      %16 = vector.load %arg7[%c0_10, %c0_11] : memref<256x128xf32, #tpu.memory_space<vmem>>, vector<256x128xf32>
      tpu.vector_store %arg7[%c0_10, %c0_11], %15 {strides = array<i32>} : memref<256x128xf32, #tpu.memory_space<vmem>>, vector<256x128xf32>,
    } else {
    }
    %c512_i32 = arith.constant 512 : i32
    %3 = arith.muli %arg1, %c512_i32 : i32
    %4 = tpu.assume_multiple %3, 512 : i32
    %5 = arith.index_cast %4 : i32 to index
    %c0 = arith.constant 0 : index
    %6 = vector.load %arg3[%5, %c0] : memref<512x128xbf16, #tpu.memory_space<vmem>>, vector<512x128xbf16>
    %c0_1 = arith.constant 0 : index
    %c0_2 = arith.constant 0 : index
    %7 = vector.load %arg7[%c0_1, %c0_2] : memref<256x128xf32, #tpu.memory_space<vmem>>, vector<256x128xf32>
    %c0_3 = arith.constant 0 : index
    %c0_4 = arith.constant 0 : index
    %8 = vector.load %arg2[%c0_3, %c0_4] : memref<256x512xbf16, #tpu.memory_space<vmem>>, vector<256x512xbf16>
    %cst = arith.constant dense<0.000000e+00> : vector<256x128xf32>
    %9 = tpu.matmul %8, %6, %cst {dimension_numbers = #tpu.dot_dimension_numbers<[1], [0], [0], [1], [0, 0, 1, 1], [], []>} : vector<256x512xbf16>, vector<512x128xbf16>, vector<256x128xf32> -> vector<256x128xf32>
    %10 = arith.addf %7, %9 : vector<256x128xf32>
    %c0_5 = arith.constant 0 : index
    %c0_6 = arith.constant 0 : index
    %11 = vector.load %arg7[%c0_5, %c0_6] : memref<256x128xf32, #tpu.memory_space<vmem>>, vector<256x128xf32>
    tpu.vector_store %arg7[%c0_5, %c0_6], %10 {strides = array<i32>} : memref<256x128xf32, #tpu.memory_space<vmem>>, vector<256x128xf32>,
    %c0_i32_7 = arith.constant 0 : i32
    %12 = arith.cmpi eq, %arg1, %c0_i32_7 : i32
    %13 = arith.extui %12 : i1 to i32
    %c0_i32_8 = arith.constant 0 : i32
    %14 = arith.cmpi ne, %13, %c0_i32_8 : i32
    scf.if %14 {
      %c0_9 = arith.constant 0 : index
      %c0_10 = arith.constant 0 : index
      %15 = vector.load %arg7[%c0_9, %c0_10] : memref<256x128xf32, #tpu.memory_space<vmem>>, vector<256x128xf32>
      %16 = arith.truncf %15 : vector<256x128xf32> to vector<256x128xbf16>
      %c0_11 = arith.constant 0 : index
      %c0_12 = arith.constant 0 : index
      %17 = vector.load %arg4[%c0_11, %c0_12] : memref<128x128xbf16, #tpu.memory_space<vmem>>, vector<128x128xbf16>
      %cst_13 = arith.constant dense<0.000000e+00> : vector<256x128xf32>
      %18 = tpu.matmul %16, %17, %cst_13 {dimension_numbers = #tpu.dot_dimension_numbers<[1], [0], [0], [1], [0, 0, 1, 1], [], []>} : vector<256x128xbf16>, vector<128x128xbf16>, vector<256x128xf32> -> vector<256x128xf32>
      %c0_14 = arith.constant 0 : index
      %c0_15 = arith.constant 0 : index
      %19 = vector.load %arg5[%c0_14, %c0_15] : memref<1x128xf32, #tpu.memory_space<vmem>>, vector<1x128xf32>
      %20 = vector.broadcast %19 : vector<1x128xf32> to vector<256x128xf32>
      %21 = arith.addf %18, %20 : vector<256x128xf32>
      %cst_16 = arith.constant 0.000000e+00 : f32
      %22 = vector.broadcast %cst_16 : f32 to vector<256x128xf32>
      %23 = arith.maximumf %21, %22 : vector<256x128xf32>
      %24 = arith.truncf %23 : vector<256x128xf32> to vector<256x128xbf16>
      %c0_17 = arith.constant 0 : index
      %c0_18 = arith.constant 0 : index
      %25 = vector.load %arg6[%c0_17, %c0_18] : memref<256x128xbf16, #tpu.memory_space<vmem>>, vector<256x128xbf16>
      tpu.vector_store %arg6[%c0_17, %c0_18], %24 {strides = array<i32>} : memref<256x128xbf16, #tpu.memory_space<vmem>>, vector<256x128xbf16>,
    } else {
    }
    return
  }
  func.func @transform_0(%arg0: i32, %arg1: i32) -> (i32, i32) {
    %c0_i32 = arith.constant 0 : i32
    return %arg0, %arg1 : i32, i32
  }
  func.func @transform_1(%arg0: i32, %arg1: i32) -> (i32, i32) {
    %c0_i32 = arith.constant 0 : i32
    %c0_i32_0 = arith.constant 0 : i32
    %c0_i32_1 = arith.constant 0 : i32
    return %c0_i32, %c0_i32_0 : i32, i32
  }
  func.func @transform_2(%arg0: i32, %arg1: i32) -> (i32, i32) {
    %c0_i32 = arith.constant 0 : i32
    %c0_i32_0 = arith.constant 0 : i32
    %c0_i32_1 = arith.constant 0 : i32
    return %c0_i32, %c0_i32_0 : i32, i32
  }
  func.func @transform_3(%arg0: i32, %arg1: i32) -> (i32, i32) {
    %c0_i32 = arith.constant 0 : i32
    %c0_i32_0 = arith.constant 0 : i32
    %c0_i32_1 = arith.constant 0 : i32
    return %c0_i32, %c0_i32_0 : i32, i32
  }
  func.func @transform_4(%arg0: i32, %arg1: i32) -> (i32, i32) {
    %c0_i32 = arith.constant 0 : i32
    %c0_i32_0 = arith.constant 0 : i32
    return %arg0, %c0_i32 : i32, i32
  }
}

module attributes {stable_mosaic.version = 11 : i64} {
  func.func @gcn_propagate_kernel(%arg0: i32, %arg1: i32, %arg2: memref<256x512xbf16, #tpu.memory_space<vmem>>, %arg3: memref<512x128xbf16, #tpu.memory_space<vmem>>, %arg4: memref<128x128xbf16, #tpu.memory_space<vmem>>, %arg5: memref<1x128xf32, #tpu.memory_space<vmem>>, %arg6: memref<256x128xf32, #tpu.memory_space<vmem>>, %arg7: memref<256x128xf32, #tpu.memory_space<vmem>>) attributes {dimension_semantics = [#tpu.dimension_semantics<parallel>, #tpu.dimension_semantics<arbitrary>], iteration_bounds = array<i64: 2, 1>, scalar_prefetch = 0 : i64, scratch_operands = 1 : i64, tpu.core_type = #tpu.core_type<tc>, window_params = [{transform_indices = @transform_0, window_bounds = array<i64: 256, 512>}, {pipeline_mode = #tpu.pipeline_mode<synchronous>, transform_indices = @transform_1, window_bounds = array<i64: 512, 128>}, {pipeline_mode = #tpu.pipeline_mode<synchronous>, transform_indices = @transform_2, window_bounds = array<i64: 128, 128>}, {pipeline_mode = #tpu.pipeline_mode<synchronous>, transform_indices = @transform_3, window_bounds = array<i64: 1, 128>}, {transform_indices = @transform_4, window_bounds = array<i64: 256, 128>}]} {
    %c0_i32 = arith.constant 0 : i32
    %0 = arith.cmpi eq, %arg1, %c0_i32 : i32
    %1 = arith.extui %0 : i1 to i32
    %c0_i32_0 = arith.constant 0 : i32
    %2 = arith.cmpi ne, %1, %c0_i32_0 : i32
    scf.if %2 {
      %cst_9 = arith.constant 0.000000e+00 : f32
      %15 = vector.broadcast %cst_9 : f32 to vector<256x128xf32>
      %c0_10 = arith.constant 0 : index
      %c0_11 = arith.constant 0 : index
      %16 = vector.load %arg7[%c0_10, %c0_11] : memref<256x128xf32, #tpu.memory_space<vmem>>, vector<256x128xf32>
      tpu.vector_store %arg7[%c0_10, %c0_11], %15 {strides = array<i32>} : memref<256x128xf32, #tpu.memory_space<vmem>>, vector<256x128xf32>,
    } else {
    }
    %c512_i32 = arith.constant 512 : i32
    %3 = arith.muli %arg1, %c512_i32 : i32
    %4 = tpu.assume_multiple %3, 512 : i32
    %5 = arith.index_cast %4 : i32 to index
    %c0 = arith.constant 0 : index
    %6 = vector.load %arg3[%5, %c0] : memref<512x128xbf16, #tpu.memory_space<vmem>>, vector<512x128xbf16>
    %c0_1 = arith.constant 0 : index
    %c0_2 = arith.constant 0 : index
    %7 = vector.load %arg7[%c0_1, %c0_2] : memref<256x128xf32, #tpu.memory_space<vmem>>, vector<256x128xf32>
    %c0_3 = arith.constant 0 : index
    %c0_4 = arith.constant 0 : index
    %8 = vector.load %arg2[%c0_3, %c0_4] : memref<256x512xbf16, #tpu.memory_space<vmem>>, vector<256x512xbf16>
    %cst = arith.constant dense<0.000000e+00> : vector<256x128xf32>
    %9 = tpu.matmul %8, %6, %cst {dimension_numbers = #tpu.dot_dimension_numbers<[1], [0], [0], [1], [0, 0, 1, 1], [], []>} : vector<256x512xbf16>, vector<512x128xbf16>, vector<256x128xf32> -> vector<256x128xf32>
    %10 = arith.addf %7, %9 : vector<256x128xf32>
    %c0_5 = arith.constant 0 : index
    %c0_6 = arith.constant 0 : index
    %11 = vector.load %arg7[%c0_5, %c0_6] : memref<256x128xf32, #tpu.memory_space<vmem>>, vector<256x128xf32>
    tpu.vector_store %arg7[%c0_5, %c0_6], %10 {strides = array<i32>} : memref<256x128xf32, #tpu.memory_space<vmem>>, vector<256x128xf32>,
    %c0_i32_7 = arith.constant 0 : i32
    %12 = arith.cmpi eq, %arg1, %c0_i32_7 : i32
    %13 = arith.extui %12 : i1 to i32
    %c0_i32_8 = arith.constant 0 : i32
    %14 = arith.cmpi ne, %13, %c0_i32_8 : i32
    scf.if %14 {
      %c0_9 = arith.constant 0 : index
      %c0_10 = arith.constant 0 : index
      %15 = vector.load %arg7[%c0_9, %c0_10] : memref<256x128xf32, #tpu.memory_space<vmem>>, vector<256x128xf32>
      %16 = arith.truncf %15 : vector<256x128xf32> to vector<256x128xbf16>
      %c0_11 = arith.constant 0 : index
      %c0_12 = arith.constant 0 : index
      %17 = vector.load %arg4[%c0_11, %c0_12] : memref<128x128xbf16, #tpu.memory_space<vmem>>, vector<128x128xbf16>
      %cst_13 = arith.constant dense<0.000000e+00> : vector<256x128xf32>
      %18 = tpu.matmul %16, %17, %cst_13 {dimension_numbers = #tpu.dot_dimension_numbers<[1], [0], [0], [1], [0, 0, 1, 1], [], []>} : vector<256x128xbf16>, vector<128x128xbf16>, vector<256x128xf32> -> vector<256x128xf32>
      %c0_14 = arith.constant 0 : index
      %c0_15 = arith.constant 0 : index
      %19 = vector.load %arg5[%c0_14, %c0_15] : memref<1x128xf32, #tpu.memory_space<vmem>>, vector<1x128xf32>
      %20 = vector.broadcast %19 : vector<1x128xf32> to vector<256x128xf32>
      %21 = arith.addf %18, %20 : vector<256x128xf32>
      %c0_16 = arith.constant 0 : index
      %c0_17 = arith.constant 0 : index
      %22 = vector.load %arg6[%c0_16, %c0_17] : memref<256x128xf32, #tpu.memory_space<vmem>>, vector<256x128xf32>
      tpu.vector_store %arg6[%c0_16, %c0_17], %21 {strides = array<i32>} : memref<256x128xf32, #tpu.memory_space<vmem>>, vector<256x128xf32>,
    } else {
    }
    return
  }
  func.func @transform_0(%arg0: i32, %arg1: i32) -> (i32, i32) {
    %c0_i32 = arith.constant 0 : i32
    return %arg0, %arg1 : i32, i32
  }
  func.func @transform_1(%arg0: i32, %arg1: i32) -> (i32, i32) {
    %c0_i32 = arith.constant 0 : i32
    %c0_i32_0 = arith.constant 0 : i32
    %c0_i32_1 = arith.constant 0 : i32
    return %c0_i32, %c0_i32_0 : i32, i32
  }
  func.func @transform_2(%arg0: i32, %arg1: i32) -> (i32, i32) {
    %c0_i32 = arith.constant 0 : i32
    %c0_i32_0 = arith.constant 0 : i32
    %c0_i32_1 = arith.constant 0 : i32
    return %c0_i32, %c0_i32_0 : i32, i32
  }
  func.func @transform_3(%arg0: i32, %arg1: i32) -> (i32, i32) {
    %c0_i32 = arith.constant 0 : i32
    %c0_i32_0 = arith.constant 0 : i32
    %c0_i32_1 = arith.constant 0 : i32
    return %c0_i32, %c0_i32_0 : i32, i32
  }
  func.func @transform_4(%arg0: i32, %arg1: i32) -> (i32, i32) {
    %c0_i32 = arith.constant 0 : i32
    %c0_i32_0 = arith.constant 0 : i32
    return %arg0, %c0_i32 : i32, i32
  }
}

</mosaic_0001>

<bundles_post_ra>
// kernel: generator_forward.3
= control target key start
LH: loop header
LB: loop body
LE: loop exit
PB: predicated region body
PF: predicated region fallthrough
CT: control target
= control target key end

     0   :  { %s2309_s15 = smov 0   ;;  %s2311_s16 = smov 0   ;;  %s2742_s0 = inlined_call_operand.vmem [shape: bf16[512,512], index: 0, kind: input, shape index: {}]   ;;  %s2743_s1 = inlined_call_operand.vmem [shape: bf16[512,128], index: 1, kind: input, shape index: {}]   ;;  %s2744_s2 = inlined_call_operand.vmem [shape: bf16[128,128], index: 2, kind: input, shape index: {}]   ;;  %s2745_s3 = inlined_call_operand.vmem [shape: f32[1,128], index: 3, kind: input, shape index: {}]   ;;  %s2746_s4 = inlined_call_operand.vmem [shape: f32[512,128], index: 4, kind: output, shape index: {}]  }
   0x1   :  { %s2313_s17 = smov 0  }
   0x2 LB: > { %s26_s18 = sadd.s32 1, %s2278_s16  ;;  %p1682_p0 = scmp.ge.s32.totalorder %s2282_s17, 1  ;;  %s2282_s17 = sphi %s2313_s17, %s14_s17   ;;  %s2278_s16 = sphi %s2311_s16, %s2748_s16   ;;  %s2274_s15 = sphi %s2309_s15, %s2747_s15  }
   0x3   : > { %p28_p1 = scmp.ge.s32.totalorder %s26_s18, 2  ;;  %p183_p2 = scmp.lt.s32.totalorder %s2282_s17, 3 }
   0x5   : > { %s2750_s18 = smov (%p28_p1, %s26_s18), 0  ;;  %p184_p3 = pnand %p1682_p0, %p183_p2 }
   0x6   : > { %s1683_s25 = sshll.u32 (!%p184_p3), %s2274_s15, 5 }
   0x7   : > { %187 = sbr.rel (%p184_p3) target bundleno = 632 (0x278), region = 36  ;;  %p216_p4 = scmp.lt.s32.totalorder (!%p184_p3), %s1683_s25, 63 }
   0xc   : > { %v2114_v0 = vld [vmem:[%s2743_s1 + $0x38] sm:$0xff]  ;;  %v2113_v1 = vld [vmem:[%s2743_s1 + $0x30] sm:$0xff]  ;;  %v2112_v2 = vld [vmem:[%s2743_s1 + $0x28] sm:$0xff]  ;;  %s2752_s25 = smov (!%p216_p4, %s1683_s25), 63 }
   0xd   : > { %2211 = vmatpush.bf16.msra.mxu1 %v2114_v0  ;;  %2212 = vmatpush.bf16.msra.mxu2 %v2114_v0  ;;  %v2111_v3 = vld [vmem:[%s2743_s1 + $0x20] sm:$0xff]  ;;  %v2110_v4 = vld [vmem:[%s2743_s1 + $0x18] sm:$0xff]  ;;  %v2109_v5 = vld [vmem:[%s2743_s1 + $0x10] sm:$0xff]  ;;  %s2106_s6 = sshll.u32 %s2752_s25, 4 }
   0xe   : > { %2213 = vmatpush.bf16.msra.mxu3 %v2114_v0  ;;  %945 = vmatpush.bf16.msra.mxu0 %v2114_v0  ;;  %v2108_v6 = vld [vmem:[%s2743_s1 + $0x8] sm:$0xff]  ;;  %s2357_s11 = scalar_lea.vmem %s2742_s0, %s2106_s6  ;;  %v2107_v7 = vld [vmem:[%s2743_s1] sm:$0xff]  ;;  %v2130_v14 = vld [vmem:[%s2743_s1 + $0xb8] sm:$0xff] }
   0xf   : > { %v1754_v8 = vld [vmem:[%s2357_s11 + $0x80] sm:$0xf]  ;;  %v2157_v9 = vld [vmem:[%s2357_s11 + $0x8c] sm:$0xf0]  ;;  %v2138_v15 = vld [vmem:[%s2743_s1 + $0xf8] sm:$0xff] }
  0x10   : > { %v1818_v10 = vld [vmem:[%s2357_s11 + $0x100] sm:$0xf]  ;;  %v2173_v11 = vld [vmem:[%s2357_s11 + $0x10c] sm:$0xf0]  ;;  %v2122_v16 = vld [vmem:[%s2743_s1 + $0x78] sm:$0xff]  ;;  %v1755_v17 = vor.u32 %v2157_v9, %v1754_v8 }
  0x11   : > { %2214 = vmatpush.bf16.msra.mxu1 %v2113_v1  ;;  %2215 = vmatpush.bf16.msra.mxu2 %v2113_v1  ;;  %v1882_v12 = vld [vmem:[%s2357_s11 + $0x180] sm:$0xf]  ;;  %v2189_v13 = vld [vmem:[%s2357_s11 + $0x18c] sm:$0xf0]  ;;  %v1819_v18 = vor.u32 %v2173_v11, %v1818_v10  ;;  %v2128_v23 = vld [vmem:[%s2743_s1 + $0xa8] sm:$0xff] }
  0x12   : > { %2216 = vmatpush.bf16.msra.mxu3 %v2113_v1  ;;  %946 = vmatpush.bf16.msra.mxu0 %v2113_v1  ;;  %v1883_v19 = vor.u32 %v2189_v13, %v1882_v12  ;;  %v2129_v20 = vld [vmem:[%s2743_s1 + $0xb0] sm:$0xff]  ;;  %v2136_v24 = vld [vmem:[%s2743_s1 + $0xe8] sm:$0xff]  ;;  %v2127_v26 = vld [vmem:[%s2743_s1 + $0xa0] sm:$0xff] }
  0x13   : > { %v2137_v21 = vld [vmem:[%s2743_s1 + $0xf0] sm:$0xff]  ;;  %v2120_v25 = vld [vmem:[%s2743_s1 + $0x68] sm:$0xff]  ;;  %v2135_v27 = vld [vmem:[%s2743_s1 + $0xe0] sm:$0xff] }
  0x14   : > { %v2121_v22 = vld [vmem:[%s2743_s1 + $0x70] sm:$0xff]  ;;  %v2119_v28 = vld [vmem:[%s2743_s1 + $0x60] sm:$0xff]  ;;  %v2126_v35 = vld [vmem:[%s2743_s1 + $0x98] sm:$0xff] }
  0x15   : > { %2217 = vmatpush.bf16.msra.mxu1 %v2112_v2  ;;  %2218 = vmatpush.bf16.msra.mxu2 %v2112_v2  ;;  %v1770_v29 = vld [vmem:[%s2357_s11 + $0xa0] sm:$0xf]  ;;  %v2161_v30 = vld [vmem:[%s2357_s11 + $0xac] sm:$0xf0]  ;;  %v2134_v36 = vld [vmem:[%s2743_s1 + $0xd8] sm:$0xff] }
  0x16   : > { %2219 = vmatpush.bf16.msra.mxu3 %v2112_v2  ;;  %947 = vmatpush.bf16.msra.mxu0 %v2112_v2  ;;  %v1834_v31 = vld [vmem:[%s2357_s11 + $0x120] sm:$0xf]  ;;  %v2177_v32 = vld [vmem:[%s2357_s11 + $0x12c] sm:$0xf0]  ;;  %v2118_v37 = vld [vmem:[%s2743_s1 + $0x58] sm:$0xff]  ;;  %v1771_v38 = vor.u32 %v2161_v30, %v1770_v29 }
  0x17   : > { %v1898_v33 = vld [vmem:[%s2357_s11 + $0x1a0] sm:$0xf]  ;;  %v2193_v34 = vld [vmem:[%s2357_s11 + $0x1ac] sm:$0xf0]  ;;  %v1835_v39 = vor.u32 %v2177_v32, %v1834_v31  ;;  %v2124_v44 = vld [vmem:[%s2743_s1 + $0x88] sm:$0xff] }
  0x18   : > { %v1899_v40 = vor.u32 %v2193_v34, %v1898_v33  ;;  %v2125_v41 = vld [vmem:[%s2743_s1 + $0x90] sm:$0xff]  ;;  %v1690_v45 = vld [vmem:[%s2357_s11] sm:$0xf]  ;;  %v2132_v46 = vld [vmem:[%s2743_s1 + $0xc8] sm:$0xff] }
  0x19   : > { %2220 = vmatpush.bf16.msra.mxu1 %v2111_v3  ;;  %2221 = vmatpush.bf16.msra.mxu2 %v2111_v3  ;;  %v2133_v42 = vld [vmem:[%s2743_s1 + $0xd0] sm:$0xff]  ;;  %v2116_v47 = vld [vmem:[%s2743_s1 + $0x48] sm:$0xff]  ;;  %v2123_v50 = vld [vmem:[%s2743_s1 + $0x80] sm:$0xff] }
  0x1a   : > { %2222 = vmatpush.bf16.msra.mxu3 %v2111_v3  ;;  %948 = vmatpush.bf16.msra.mxu0 %v2111_v3  ;;  %v2117_v43 = vld [vmem:[%s2743_s1 + $0x50] sm:$0xff]  ;;  %v2131_v51 = vld [vmem:[%s2743_s1 + $0xc0] sm:$0xff]  ;;  %v2144_v29 = vld [vmem:[%s2357_s11 + $0x2c] sm:$0xf] }
  0x1b   : > { %v2141_v48 = vld [vmem:[%s2357_s11 + $0xc] sm:$0xf0]  ;;  %v2115_v52 = vld [vmem:[%s2743_s1 + $0x40] sm:$0xff]  ;;  %v1716_v30 = vld [vmem:[%s2357_s11 + $0x38] sm:$0xf0] }
  0x1c   : > { %v1691_v49 = vor.u32 %v2141_v48, %v1690_v45  ;;  %v1786_v53 = vld [vmem:[%s2357_s11 + $0xc0] sm:$0xf]  ;;  %v2165_v54 = vld [vmem:[%s2357_s11 + $0xcc] sm:$0xf0]  ;;  %v2139_v13 = vld [vmem:[%s2357_s11 + $0x4] sm:$0xf]  ;;  %v1719_v33 = vor.u32 %v2144_v29, %v1716_v30 }
  0x1d   : > { %2223 = vmatpush.bf16.msra.mxu1 %v2110_v4  ;;  %2224 = vmatpush.bf16.msra.mxu2 %v2110_v4  ;;  %v1850_v55 = vld [vmem:[%s2357_s11 + $0x140] sm:$0xf]  ;;  %v2181_v56 = vld [vmem:[%s2357_s11 + $0x14c] sm:$0xf0]  ;;  %v1787_v59 = vor.u32 %v2165_v54, %v1786_v53  ;;  %v2147_v34 = vld [vmem:[%s2357_s11 + $0x44] sm:$0xf] }
  0x1e   : > { %2225 = vmatpush.bf16.msra.mxu3 %v2110_v4  ;;  %949 = vmatpush.bf16.msra.mxu0 %v2110_v4  ;;  %v1914_v57 = vld [vmem:[%s2357_s11 + $0x1c0] sm:$0xf]  ;;  %v2197_v58 = vld [vmem:[%s2357_s11 + $0x1cc] sm:$0xf0]  ;;  %v1851_v60 = vor.u32 %v2181_v56, %v1850_v55  ;;  %v1746_v45 = vld [vmem:[%s2357_s11 + $0x68] sm:$0xf] }
  0x1f   : > { %v1915_v61 = vor.u32 %v2197_v58, %v1914_v57  ;;  %v1706_v62 = vld [vmem:[%s2357_s11 + $0x20] sm:$0xf]  ;;  %v2145_v63 = vld [vmem:[%s2357_s11 + $0x2c] sm:$0xf0]  ;;  %v1748_v48 = vld [vmem:[%s2357_s11 + $0x78] sm:$0xf0] }
  0x20   : > { %v1707_v0 = vor.u32 %v2145_v63, %v1706_v62  ;;  %v1802_v1 = vld [vmem:[%s2357_s11 + $0xe0] sm:$0xf]  ;;  %v2169_v2 = vld [vmem:[%s2357_s11 + $0xec] sm:$0xf0]  ;;  %v2155_v54 = vld [vmem:[%s2357_s11 + $0x84] sm:$0xf] }
  0x21   : > { %2226 = vmatpush.bf16.msra.mxu1 %v2109_v5  ;;  %2227 = vmatpush.bf16.msra.mxu2 %v2109_v5  ;;  %v1866_v3 = vld [vmem:[%s2357_s11 + $0x160] sm:$0xf]  ;;  %v2185_v4 = vld [vmem:[%s2357_s11 + $0x16c] sm:$0xf0]  ;;  %v1756_v55 = vld [vmem:[%s2357_s11 + $0x90] sm:$0xf0] }
  0x22   : > { %2228 = vmatpush.bf16.msra.mxu3 %v2109_v5  ;;  %950 = vmatpush.bf16.msra.mxu0 %v2109_v5  ;;  %v1930_v5 = vld [vmem:[%s2357_s11 + $0x1e0] sm:$0xf]  ;;  %v1867_v8 = vor.u32 %v2185_v4, %v1866_v3  ;;  %v2149_v11 = vld [vmem:[%s2357_s11 + $0x4c] sm:$0xf0]  ;;  %v1762_v56 = vld [vmem:[%s2357_s11 + $0x88] sm:$0xf] }
  0x23   : > { %v1722_v10 = vld [vmem:[%s2357_s11 + $0x40] sm:$0xf]  ;;  %v2209_v53 = vld [vmem:[%s2744_s2 + $0x30] sm:$0xff]  ;;  %v2158_v57 = vld [vmem:[%s2357_s11 + $0x94] sm:$0xf0] }
  0x24   : > { %v1723_v12 = vor.u32 %v2149_v11, %v1722_v10  ;;  %v2156_v58 = vld [vmem:[%s2357_s11 + $0x8c] sm:$0xf]  ;;  %v2207_v4 = vld [vmem:[%s2744_s2 + $0x20] sm:$0xff]  ;;  %v1780_v10 = vld [vmem:[%s2357_s11 + $0xb8] sm:$0xf0] }
  0x25   : > { %2229 = vmatpush.bf16.msra.mxu1 %v2108_v6  ;;  %2230 = vmatpush.bf16.msra.mxu2 %v2108_v6 }
  0x26   : > { %2231 = vmatpush.bf16.msra.mxu3 %v2108_v6  ;;  %951 = vmatpush.bf16.msra.mxu0 %v2108_v6  ;;  %v2201_v6 = vld [vmem:[%s2357_s11 + $0x1ec] sm:$0xf0] }
  0x27   : > { %v1931_v9 = vor.u32 %v2201_v6, %v1930_v5  ;;  %v2159_v5 = vld [vmem:[%s2357_s11 + $0xa4] sm:$0xf]  ;;  %v1772_v6 = vld [vmem:[%s2357_s11 + $0xb0] sm:$0xf0] }
  0x29   : > { %2232 = vmatpush.bf16.msra.mxu1 %v2107_v7  ;;  %2233 = vmatpush.bf16.msra.mxu2 %v2107_v7 }
  0x2a   : > { %2234 = vmatpush.bf16.msra.mxu3 %v2107_v7  ;;  %952 = vmatpush.bf16.msra.mxu0 %v2107_v7  ;;  %v1803_v7 = vor.u32 %v2169_v2, %v1802_v1 }
  0x2c   : > { %973 = vmatmul.bf16.vlgmr.msra.gmra.mxu1 %v1755_v17  ;;  %993 = vmatmul.bf16.vlgmr.msra.gmra.mxu2 %v1819_v18  ;;  %v2140_v17 = vld [vmem:[%s2357_s11 + $0xc] sm:$0xf]  ;;  %v1700_v18 = vld [vmem:[%s2357_s11 + $0x18] sm:$0xf0] }
  0x2d   : > { %1123 = vmatpush.bf16.msrb.mxu2 %v2130_v14  ;;  %1034 = vmatpush.bf16.msrb.mxu1 %v2122_v16  ;;  %v1692_v14 = vld [vmem:[%s2357_s11 + $0x10] sm:$0xf0]  ;;  %v2142_v16 = vld [vmem:[%s2357_s11 + $0x14] sm:$0xf0] }
  0x2e   : > { %1212 = vmatpush.bf16.msrb.mxu3 %v2138_v15  ;;  %953 = vmatmul.bf16.vlgmr.msra.gmra.mxu0 %v1691_v49  ;;  %v1698_v15 = vld [vmem:[%s2357_s11 + $0x8] sm:$0xf] }
  0x2f   : > { %1013 = vmatmul.bf16.vlgmr.msra.gmra.mxu3 %v1883_v19  ;;  %v1695_v19 = vor.u32 %v2139_v13, %v1692_v14  ;;  %v1775_v13 = vor.u32 %v2159_v5, %v1772_v6 }
  0x31   : > { %1124 = vmatpush.bf16.msrb.mxu2 %v2129_v20  ;;  %1035 = vmatpush.bf16.msrb.mxu1 %v2121_v22  ;;  %v1699_v20 = vor.u32 %v2142_v16, %v1698_v15  ;;  %v1738_v22 = vld [vmem:[%s2357_s11 + $0x60] sm:$0xf] }
  0x32   : > { %1213 = vmatpush.bf16.msrb.mxu3 %v2137_v21  ;;  %v1703_v21 = vor.u32 %v2140_v17, %v1700_v18  ;;  %v2206_v17 = vld [vmem:[%s2744_s2 + $0x18] sm:$0xff] }
  0x35   : > { %1125 = vmatpush.bf16.msrb.mxu2 %v2128_v23  ;;  %1036 = vmatpush.bf16.msrb.mxu1 %v2120_v25  ;;  %v2153_v23 = vld [vmem:[%s2357_s11 + $0x6c] sm:$0xf0]  ;;  %v2143_v25 = vld [vmem:[%s2357_s11 + $0x24] sm:$0xf] }
  0x36   : > { %1214 = vmatpush.bf16.msrb.mxu3 %v2136_v24  ;;  %v1739_v24 = vor.u32 %v2153_v23, %v1738_v22  ;;  %v2163_v22 = vld [vmem:[%s2357_s11 + $0xc4] sm:$0xf]  ;;  %v1788_v23 = vld [vmem:[%s2357_s11 + $0xd0] sm:$0xf0] }
  0x37   : > { %v1791_v30 = vor.u32 %v2163_v22, %v1788_v23  ;;  %v2178_v22 = vld [vmem:[%s2357_s11 + $0x134] sm:$0xf0] }
  0x39   : > { %1126 = vmatpush.bf16.msrb.mxu2 %v2127_v26  ;;  %1037 = vmatpush.bf16.msrb.mxu1 %v2119_v28  ;;  %v1708_v26 = vld [vmem:[%s2357_s11 + $0x30] sm:$0xf0]  ;;  %v2146_v28 = vld [vmem:[%s2357_s11 + $0x34] sm:$0xf0] }
  0x3a   : > { %1215 = vmatpush.bf16.msrb.mxu3 %v2135_v27  ;;  %v1714_v27 = vld [vmem:[%s2357_s11 + $0x28] sm:$0xf]  ;;  %v1711_v31 = vor.u32 %v2143_v25, %v1708_v26  ;;  %v2166_v25 = vld [vmem:[%s2357_s11 + $0xd4] sm:$0xf0]  ;;  %v2164_v26 = vld [vmem:[%s2357_s11 + $0xcc] sm:$0xf] }
  0x3b   : > { %v1715_v32 = vor.u32 %v2146_v28, %v1714_v27  ;;  %v1796_v27 = vld [vmem:[%s2357_s11 + $0xd8] sm:$0xf0] }
  0x3c   : > { %978 = vmatmul.bf16.gmra.mxu1 %v1771_v38  ;;  %998 = vmatmul.bf16.gmra.mxu2 %v1835_v39  ;;  %v2148_v38 = vld [vmem:[%s2357_s11 + $0x4c] sm:$0xf]  ;;  %v1732_v39 = vld [vmem:[%s2357_s11 + $0x58] sm:$0xf0] }
  0x3d   : > { %1127 = vmatpush.bf16.msrb.mxu2 %v2126_v35  ;;  %1038 = vmatpush.bf16.msrb.mxu1 %v2118_v37  ;;  %v1724_v35 = vld [vmem:[%s2357_s11 + $0x50] sm:$0xf0]  ;;  %v2150_v37 = vld [vmem:[%s2357_s11 + $0x54] sm:$0xf0] }
  0x3e   : > { %1216 = vmatpush.bf16.msrb.mxu3 %v2134_v36  ;;  %958 = vmatmul.bf16.gmra.mxu0 %v1707_v0  ;;  %v1730_v36 = vld [vmem:[%s2357_s11 + $0x48] sm:$0xf] }
  0x3f   : > { %1018 = vmatmul.bf16.gmra.mxu3 %v1899_v40  ;;  %v1727_v40 = vor.u32 %v2147_v34, %v1724_v35  ;;  %v2208_v0 = vld [vmem:[%s2744_s2 + $0x28] sm:$0xff] }
  0x40   : > { %v2204_v34 = vld [vmem:[%s2744_s2 + $0x8] sm:$0xff] }
  0x41   : > { %1128 = vmatpush.bf16.msrb.mxu2 %v2125_v41  ;;  %1039 = vmatpush.bf16.msrb.mxu1 %v2117_v43  ;;  %v1731_v41 = vor.u32 %v2150_v37, %v1730_v36  ;;  %v2151_v43 = vld [vmem:[%s2357_s11 + $0x64] sm:$0xf] }
  0x42   : > { %1217 = vmatpush.bf16.msrb.mxu3 %v2133_v42  ;;  %v1735_v42 = vor.u32 %v2148_v38, %v1732_v39  ;;  %v2203_v38 = vld [vmem:[%s2744_s2] sm:$0xff] }
  0x43   : > { %v2167_v39 = vld [vmem:[%s2357_s11 + $0xe4] sm:$0xf] }
  0x45   : > { %1129 = vmatpush.bf16.msrb.mxu2 %v2124_v44  ;;  %1040 = vmatpush.bf16.msrb.mxu1 %v2116_v47  ;;  %v1740_v44 = vld [vmem:[%s2357_s11 + $0x70] sm:$0xf0]  ;;  %v2152_v47 = vld [vmem:[%s2357_s11 + $0x6c] sm:$0xf] }
  0x46   : > { %1218 = vmatpush.bf16.msrb.mxu3 %v2132_v46  ;;  %v2154_v46 = vld [vmem:[%s2357_s11 + $0x74] sm:$0xf0]  ;;  %v1743_v49 = vor.u32 %v2151_v43, %v1740_v44  ;;  %v2168_v43 = vld [vmem:[%s2357_s11 + $0xec] sm:$0xf]  ;;  %v1812_v44 = vld [vmem:[%s2357_s11 + $0xf8] sm:$0xf0] }
  0x49   : > { %1130 = vmatpush.bf16.msrb.mxu2 %v2123_v50  ;;  %1041 = vmatpush.bf16.msrb.mxu1 %v2115_v52  ;;  %v1747_v50 = vor.u32 %v2154_v46, %v1746_v45  ;;  %v2210_v52 = vld [vmem:[%s2744_s2 + $0x38] sm:$0xff] }
  0x4a   : > { %1219 = vmatpush.bf16.msrb.mxu3 %v2131_v51  ;;  %v1751_v51 = vor.u32 %v2152_v47, %v1748_v48  ;;  %1484 = vmatpush.bf16.msrb.mxu0 %v2210_v52 }
  0x4c   : > { %983 = vmatmul.bf16.gmra.mxu1 %v1787_v59  ;;  %1003 = vmatmul.bf16.gmra.mxu2 %v1851_v60  ;;  %v1764_v59 = vld [vmem:[%s2357_s11 + $0x98] sm:$0xf0]  ;;  %v1759_v60 = vor.u32 %v2155_v54, %v1756_v55  ;;  %v2171_v55 = vld [vmem:[%s2357_s11 + $0x104] sm:$0xf] }
  0x4d   : > { %v1767_v63 = vor.u32 %v2156_v58, %v1764_v59  ;;  %v2174_v58 = vld [vmem:[%s2357_s11 + $0x114] sm:$0xf0]  ;;  %v2172_v59 = vld [vmem:[%s2357_s11 + $0x10c] sm:$0xf] }
  0x4e   : > { %963 = vmatmul.bf16.gmra.mxu0 %v1723_v12 }
  0x4f   : > { %1023 = vmatmul.bf16.gmra.mxu3 %v1915_v61  ;;  %1485 = vmatpush.bf16.msrb.mxu0 %v2209_v53  ;;  %v1763_v61 = vor.u32 %v2158_v57, %v1762_v56  ;;  %v1820_v56 = vld [vmem:[%s2357_s11 + $0x110] sm:$0xf0]  ;;  %v1826_v57 = vld [vmem:[%s2357_s11 + $0x108] sm:$0xf] }
  0x53   : > { %1486 = vmatpush.bf16.msrb.mxu0 %v2208_v0  ;;  %v1823_v0 = vor.u32 %v2171_v55, %v1820_v56  ;;  %v1852_v55 = vld [vmem:[%s2357_s11 + $0x150] sm:$0xf0]  ;;  %v1858_v56 = vld [vmem:[%s2357_s11 + $0x148] sm:$0xf] }
  0x57   : > { %1487 = vmatpush.bf16.msrb.mxu0 %v2207_v4  ;;  %v1827_v4 = vor.u32 %v2174_v58, %v1826_v57  ;;  %v2182_v57 = vld [vmem:[%s2357_s11 + $0x154] sm:$0xf0] }
  0x5b   : > { %1488 = vmatpush.bf16.msrb.mxu0 %v2206_v17  ;;  %v1836_v17 = vld [vmem:[%s2357_s11 + $0x130] sm:$0xf0] }
  0x5c   : > { %988 = vmatmul.bf16.gmra.mxu1 %v1803_v7  ;;  %1008 = vmatmul.bf16.gmra.mxu2 %v1867_v8  ;;  %v1778_v7 = vld [vmem:[%s2357_s11 + $0xa8] sm:$0xf]  ;;  %v2162_v8 = vld [vmem:[%s2357_s11 + $0xb4] sm:$0xf0] }
  0x5d   : > { %v1779_v14 = vor.u32 %v2162_v8, %v1778_v7 }
  0x5e   : > { %968 = vmatmul.bf16.gmra.mxu0 %v1739_v24  ;;  %v1794_v24 = vld [vmem:[%s2357_s11 + $0xc8] sm:$0xf] }
  0x5f   : > { %1028 = vmatmul.bf16.gmra.mxu3 %v1931_v9  ;;  %v2160_v9 = vld [vmem:[%s2357_s11 + $0xac] sm:$0xf] }
  0x60   : > { %v1783_v16 = vor.u32 %v2160_v9, %v1780_v10 }
  0x6c   : > { %1042 = vmatmul.bf16.vlgmr.msrb.gmra.mxu1 %v1695_v19  ;;  %1131 = vmatmul.bf16.vlgmr.msrb.gmra.mxu2 %v1699_v20 }
  0x6f   : > { %1220 = vmatmul.bf16.vlgmr.msrb.gmra.mxu3 %v1703_v21  ;;  %v2205_v21 = vld [vmem:[%s2744_s2 + $0x10] sm:$0xff] }
  0x70   : > { %1489 = vmatpush.bf16.msrb.mxu0 %v2205_v21  ;;  %v1842_v21 = vld [vmem:[%s2357_s11 + $0x128] sm:$0xf] }
  0x74   : > { %1490 = vmatpush.bf16.msrb.mxu0 %v2204_v34  ;;  %v1843_v34 = vor.u32 %v2178_v22, %v1842_v21 }
  0x78   : > { %1491 = vmatpush.bf16.msrb.mxu0 %v2203_v38 }
  0x7c   : > { %1047 = vmatmul.bf16.gmra.mxu1 %v1711_v31  ;;  %1136 = vmatmul.bf16.gmra.mxu2 %v1715_v32  ;;  %v1795_v31 = vor.u32 %v2166_v25, %v1794_v24  ;;  %v2176_v25 = vld [vmem:[%s2357_s11 + $0x12c] sm:$0xf] }
  0x7f   : > { %1225 = vmatmul.bf16.gmra.mxu3 %v1719_v33  ;;  %v1799_v33 = vor.u32 %v2164_v26, %v1796_v27  ;;  %v1844_v26 = vld [vmem:[%s2357_s11 + $0x138] sm:$0xf0] }
  0x8c   : > { %1052 = vmatmul.bf16.gmra.mxu1 %v1727_v40  ;;  %1141 = vmatmul.bf16.gmra.mxu2 %v1731_v41  ;;  %v1804_v40 = vld [vmem:[%s2357_s11 + $0xf0] sm:$0xf0]  ;;  %v1810_v41 = vld [vmem:[%s2357_s11 + $0xe8] sm:$0xf] }
  0x8d   : > { %v1807_v47 = vor.u32 %v2167_v39, %v1804_v40  ;;  %v1847_v39 = vor.u32 %v2176_v25, %v1844_v26  ;;  %v2183_v26 = vld [vmem:[%s2357_s11 + $0x164] sm:$0xf] }
  0x8f   : > { %1230 = vmatmul.bf16.gmra.mxu3 %v1735_v42  ;;  %v2170_v42 = vld [vmem:[%s2357_s11 + $0xf4] sm:$0xf0] }
  0x90   : > { %v1811_v48 = vor.u32 %v2170_v42, %v1810_v41 }
  0x9c   : > { %1057 = vmatmul.bf16.gmra.mxu1 %v1743_v49  ;;  %1146 = vmatmul.bf16.gmra.mxu2 %v1747_v50  ;;  %v1815_v50 = vor.u32 %v2168_v43, %v1812_v44 }
  0x9f   : > { %1235 = vmatmul.bf16.gmra.mxu3 %v1751_v51 }
  0xa9   : > { %v2502_v62 = vpop.f32.mrf.mxu1 }
  0xab   : > { %v954_v52 = vpop.f32.mrf.mxu0 }
  0xac   : > { %1062 = vmatmul.bf16.gmra.mxu1 %v1759_v60  ;;  %1151 = vmatmul.bf16.gmra.mxu2 %v1763_v61  ;;  %v1828_v60 = vld [vmem:[%s2357_s11 + $0x118] sm:$0xf0] }
  0xad   : > { %v1831_v6 = vor.u32 %v2172_v59, %v1828_v60  ;;  %v2180_v60 = vld [vmem:[%s2357_s11 + $0x14c] sm:$0xf] }
  0xaf   : > { %1240 = vmatmul.bf16.gmra.mxu3 %v1767_v63  ;;  %v2507_v1 = vpop.f32.mrf.mxu2 }
  0xb1   : > { %v2511_v3 = vpop.f32.mrf.mxu1 }
  0xb2   : > { %v2509_v2 = vpop.f32.mrf.mxu3 }
  0xb3   : > { %v956_v7 = vpop.f32.mrf.mxu0 }
  0xb7   : > { %v2522_v11 = vpop.f32.mrf.mxu2 }
  0xb9   : > { %v2526_v15 = vpop.f32.mrf.mxu1 }
  0xba   : > { %v2524_v12 = vpop.f32.mrf.mxu3 }
  0xbc   : > { %1067 = vmatmul.bf16.gmra.mxu1 %v1775_v13  ;;  %1156 = vmatmul.bf16.gmra.mxu2 %v1779_v14  ;;  %v959_v14 = vpop.f32.mrf.mxu0 }
  0xbf   : > { %1245 = vmatmul.bf16.gmra.mxu3 %v1783_v16  ;;  %v2531_v18 = vpop.f32.mrf.mxu2  ;;  %v2175_v16 = vld [vmem:[%s2357_s11 + $0x124] sm:$0xf] }
  0xc1   : > { %v2535_v20 = vpop.f32.mrf.mxu1 }
  0xc2   : > { %v2533_v19 = vpop.f32.mrf.mxu3 }
  0xc4   : > { %v961_v43 = vpop.f32.mrf.mxu0 }
  0xc7   : > { %v2546_v28 = vpop.f32.mrf.mxu2 }
  0xc9   : > { %v2550_v32 = vpop.f32.mrf.mxu1 }
  0xca   : > { %v2548_v29 = vpop.f32.mrf.mxu3 }
  0xcc   : > { %1072 = vmatmul.bf16.gmra.mxu1 %v1791_v30  ;;  %1161 = vmatmul.bf16.gmra.mxu2 %v1795_v31 }
  0xcf   : > { %1250 = vmatmul.bf16.gmra.mxu3 %v1799_v33  ;;  %v2555_v35 = vpop.f32.mrf.mxu2  ;;  %v1839_v33 = vor.u32 %v2175_v16, %v1836_v17 }
  0xd1   : > { %v2559_v37 = vpop.f32.mrf.mxu1 }
  0xd2   : > { %v2557_v36 = vpop.f32.mrf.mxu3 }
  0xd7   : > { %v2570_v45 = vpop.f32.mrf.mxu2 }
  0xd9   : > { %v2574_v49 = vpop.f32.mrf.mxu1 }
  0xda   : > { %v2572_v46 = vpop.f32.mrf.mxu3 }
  0xdc   : > { %1077 = vmatmul.bf16.gmra.mxu1 %v1807_v47  ;;  %1166 = vmatmul.bf16.gmra.mxu2 %v1811_v48 }
  0xdf   : > { %1255 = vmatmul.bf16.gmra.mxu3 %v1815_v50  ;;  %v2576_v51 = vpop.f32.mrf.mxu2 }
  0xe1   : > { %v2580_v54 = vpop.f32.mrf.mxu1 }
  0xe2   : > { %v2578_v53 = vpop.f32.mrf.mxu3 }
  0xe7   : > { %v2588_v61 = vpop.f32.mrf.mxu2 }
  0xe9   : > { %v1043_v5 = vpop.f32.mrf.mxu1 }
  0xea   : > { %v2590_v63 = vpop.f32.mrf.mxu3  ;;  %v1044_v13 = vadd.f32 %v1043_v5, %v954_v52  ;;  %v2179_v52 = vld [vmem:[%s2357_s11 + $0x144] sm:$0xf] }
  0xec   : > { %1082 = vmatmul.bf16.gmra.mxu1 %v1823_v0  ;;  %1171 = vmatmul.bf16.gmra.mxu2 %v1827_v4  ;;  %v1860_v0 = vld [vmem:[%s2357_s11 + $0x158] sm:$0xf0]  ;;  %v964_v4 = vpop.f32.mrf.mxu0 }
  0xef   : > { %1260 = vmatmul.bf16.gmra.mxu3 %v1831_v6  ;;  %v1132_v8 = vpop.f32.mrf.mxu2 }
  0xf0   : > { %v1133_v23 = vadd.f32 %v1132_v8, %v1044_v13  ;;  %v1855_v8 = vor.u32 %v2179_v52, %v1852_v55  ;;  %v1863_v13 = vor.u32 %v2180_v60, %v1860_v0  ;;  %v2187_v0 = vld [vmem:[%s2357_s11 + $0x184] sm:$0xf] }
  0xf1   : > { %v1045_v10 = vpop.f32.mrf.mxu1 }
  0xf2   : > { %v1221_v9 = vpop.f32.mrf.mxu3  ;;  %v1046_v24 = vadd.f32 %v1045_v10, %v956_v7 }
  0xf3   : > { %v1222_v40 = vadd.f32 %v1221_v9, %v1133_v23  ;;  %v1859_v9 = vor.u32 %v2182_v57, %v1858_v56 }
  0xf4   : > { %v966_v23 = vpop.f32.mrf.mxu0 }
  0xf7   : > { %v1134_v27 = vpop.f32.mrf.mxu2 }
  0xf8   : > { %v1135_v30 = vadd.f32 %v1134_v27, %v1046_v24  ;;  %v1868_v27 = vld [vmem:[%s2357_s11 + $0x170] sm:$0xf0] }
  0xf9   : > { %v1048_v38 = vpop.f32.mrf.mxu1 }
  0xfa   : > { %v1223_v31 = vpop.f32.mrf.mxu3  ;;  %v1049_v50 = vadd.f32 %v1048_v38, %v959_v14  ;;  %v2184_v38 = vld [vmem:[%s2357_s11 + $0x16c] sm:$0xf] }
  0xfb   : > { %v1224_v41 = vadd.f32 %v1223_v31, %v1135_v30  ;;  %v1874_v30 = vld [vmem:[%s2357_s11 + $0x168] sm:$0xf]  ;;  %v2186_v31 = vld [vmem:[%s2357_s11 + $0x174] sm:$0xf0] }
  0xfc   : > { %1087 = vmatmul.bf16.gmra.mxu1 %v1839_v33  ;;  %1176 = vmatmul.bf16.gmra.mxu2 %v1843_v34  ;;  %v969_v55 = vpop.f32.mrf.mxu0 }
  0xfd   : > { %v1400_v42 = vpack.c.bf16 %v1224_v41, %v1222_v40 }
  0xff   : > { %1265 = vmatmul.bf16.gmra.mxu3 %v1847_v39  ;;  %1492 = vmatmul.bf16.vlgmr.msrb.gmra.mxu0 %v1400_v42  ;;  %v1137_v44 = vpop.f32.mrf.mxu2  ;;  %v1876_v39 = vld [vmem:[%s2357_s11 + $0x178] sm:$0xf0] }
 0x100   : > { %v1138_v58 = vadd.f32 %v1137_v44, %v1049_v50  ;;  %v1875_v44 = vor.u32 %v2186_v31, %v1874_v30 }
 0x101   : > { %v1050_v48 = vpop.f32.mrf.mxu1 }
 0x102   : > { %v1226_v47 = vpop.f32.mrf.mxu3  ;;  %v1051_v59 = vadd.f32 %v1050_v48, %v961_v43  ;;  %v1871_v43 = vor.u32 %v2183_v26, %v1868_v27  ;;  %v1879_v48 = vor.u32 %v2184_v38, %v1876_v39  ;;  %v2191_v38 = vld [vmem:[%s2357_s11 + $0x1a4] sm:$0xf]  ;;  %v1900_v39 = vld [vmem:[%s2357_s11 + $0x1b0] sm:$0xf0] }
 0x103   : > { %v1227_v14 = vadd.f32 %v1226_v47, %v1138_v58 }
 0x107   : > { %v1139_v5 = vpop.f32.mrf.mxu2 }
 0x108   : > { %v1140_v6 = vadd.f32 %v1139_v5, %v1051_v59  ;;  %v1884_v5 = vld [vmem:[%s2357_s11 + $0x190] sm:$0xf0] }
 0x109   : > { %v1053_v10 = vpop.f32.mrf.mxu1 }
 0x10a   : > { %v1228_v7 = vpop.f32.mrf.mxu3  ;;  %v1054_v25 = vadd.f32 %v1053_v10, %v964_v4  ;;  %v971_v4 = vpop.f32.mrf.mxu0  ;;  %v2188_v10 = vld [vmem:[%s2357_s11 + $0x18c] sm:$0xf] }
 0x10b   : > { %v1229_v16 = vadd.f32 %v1228_v7, %v1140_v6  ;;  %v1890_v6 = vld [vmem:[%s2357_s11 + $0x188] sm:$0xf]  ;;  %v2190_v7 = vld [vmem:[%s2357_s11 + $0x194] sm:$0xf0] }
 0x10c   : > { %1092 = vmatmul.bf16.gmra.mxu1 %v1855_v8  ;;  %1181 = vmatmul.bf16.gmra.mxu2 %v1859_v9 }
 0x10d   : > { %v1401_v17 = vpack.c.bf16 %v1229_v16, %v1227_v14 }
 0x10f   : > { %1270 = vmatmul.bf16.gmra.mxu3 %v1863_v13  ;;  %1497 = vmatmul.bf16.gmra.mxu0 %v1401_v17  ;;  %v1142_v21 = vpop.f32.mrf.mxu2  ;;  %v1892_v13 = vld [vmem:[%s2357_s11 + $0x198] sm:$0xf0] }
 0x110   : > { %v1143_v33 = vadd.f32 %v1142_v21, %v1054_v25  ;;  %v1887_v21 = vor.u32 %v2187_v0, %v1884_v5 }
 0x111   : > { %v1055_v24 = vpop.f32.mrf.mxu1 }
 0x112   : > { %v1231_v22 = vpop.f32.mrf.mxu3  ;;  %v1056_v34 = vadd.f32 %v1055_v24, %v966_v23  ;;  %v1895_v24 = vor.u32 %v2188_v10, %v1892_v13 }
 0x113   : > { %v1232_v50 = vadd.f32 %v1231_v22, %v1143_v33  ;;  %v1891_v22 = vor.u32 %v2190_v7, %v1890_v6  ;;  %v2195_v6 = vld [vmem:[%s2357_s11 + $0x1c4] sm:$0xf]  ;;  %v1916_v7 = vld [vmem:[%s2357_s11 + $0x1d0] sm:$0xf0] }
 0x117   : > { %v1144_v40 = vpop.f32.mrf.mxu2 }
 0x118   : > { %v1145_v41 = vadd.f32 %v1144_v40, %v1056_v34  ;;  %v1906_v40 = vld [vmem:[%s2357_s11 + $0x1a8] sm:$0xf] }
 0x119   : > { %v1058_v47 = vpop.f32.mrf.mxu1 }
 0x11a   : > { %v1233_v42 = vpop.f32.mrf.mxu3  ;;  %v1059_v60 = vadd.f32 %v1058_v47, %v969_v55  ;;  %v1908_v47 = vld [vmem:[%s2357_s11 + $0x1b8] sm:$0xf0]  ;;  %v1903_v55 = vor.u32 %v2191_v38, %v1900_v39  ;;  %v2199_v38 = vld [vmem:[%s2357_s11 + $0x1e4] sm:$0xf]  ;;  %v1932_v39 = vld [vmem:[%s2357_s11 + $0x1f0] sm:$0xf0] }
 0x11b   : > { %v1234_v52 = vadd.f32 %v1233_v42, %v1145_v41  ;;  %v2194_v41 = vld [vmem:[%s2357_s11 + $0x1b4] sm:$0xf0] }
 0x11c   : > { %1097 = vmatmul.bf16.gmra.mxu1 %v1871_v43  ;;  %1186 = vmatmul.bf16.gmra.mxu2 %v1875_v44  ;;  %v2192_v44 = vld [vmem:[%s2357_s11 + $0x1ac] sm:$0xf] }
 0x11d   : > { %v1402_v56 = vpack.c.bf16 %v1234_v52, %v1232_v50 }
 0x11f   : > { %1275 = vmatmul.bf16.gmra.mxu3 %v1879_v48  ;;  %1502 = vmatmul.bf16.gmra.mxu0 %v1402_v56  ;;  %v1147_v57 = vpop.f32.mrf.mxu2  ;;  %v1907_v56 = vor.u32 %v2194_v41, %v1906_v40  ;;  %v1938_v40 = vld [vmem:[%s2357_s11 + $0x1e8] sm:$0xf]  ;;  %v2202_v41 = vld [vmem:[%s2357_s11 + $0x1f4] sm:$0xf0] }
 0x120   : > { %v1148_v8 = vadd.f32 %v1147_v57, %v1059_v60 }
 0x121   : > { %v1060_v59 = vpop.f32.mrf.mxu1 }
 0x122   : > { %v1236_v58 = vpop.f32.mrf.mxu3  ;;  %v1061_v9 = vadd.f32 %v1060_v59, %v971_v4 }
 0x123   : > { %v1237_v25 = vadd.f32 %v1236_v58, %v1148_v8  ;;  %v1922_v8 = vld [vmem:[%s2357_s11 + $0x1c8] sm:$0xf] }
 0x127   : > { %v1149_v14 = vpop.f32.mrf.mxu2 }
 0x128   : > { %v1150_v16 = vadd.f32 %v1149_v14, %v1061_v9  ;;  %v2198_v9 = vld [vmem:[%s2357_s11 + $0x1d4] sm:$0xf0]  ;;  %v2196_v14 = vld [vmem:[%s2357_s11 + $0x1cc] sm:$0xf] }
 0x129   : > { %v1063_v23 = vpop.f32.mrf.mxu1 }
 0x12a   : > { %v1238_v17 = vpop.f32.mrf.mxu3  ;;  %v1064_v34 = vadd.f32 %v1063_v23, %v2502_v62  ;;  %v1911_v62 = vor.u32 %v2192_v44, %v1908_v47  ;;  %v1919_v23 = vor.u32 %v2195_v6, %v1916_v7  ;;  %v2200_v44 = vld [vmem:[%s2357_s11 + $0x1ec] sm:$0xf]  ;;  %v1940_v47 = vld [vmem:[%s2357_s11 + $0x1f8] sm:$0xf0] }
 0x12b   : > { %v1239_v26 = vadd.f32 %v1238_v17, %v1150_v16  ;;  %v1924_v16 = vld [vmem:[%s2357_s11 + $0x1d8] sm:$0xf0]  ;;  %s1687_s11 = sshll.u32 %s2752_s25, 3 }
 0x12c   : > { %1102 = vmatmul.bf16.gmra.mxu1 %v1887_v21  ;;  %1191 = vmatmul.bf16.gmra.mxu2 %v1891_v22  ;;  %s2653_s22 = scalar_lea.vmem %s2746_s4, %s1687_s11 }
 0x12d   : > { %v1403_v27 = vpack.c.bf16 %v1239_v26, %v1237_v25 }
 0x12f   : > { %1280 = vmatmul.bf16.gmra.mxu3 %v1895_v24  ;;  %1507 = vmatmul.bf16.gmra.mxu0 %v1403_v27  ;;  %v1152_v30 = vpop.f32.mrf.mxu2  ;;  %v1923_v24 = vor.u32 %v2198_v9, %v1922_v8 }
 0x130   : > { %v1153_v42 = vadd.f32 %v1152_v30, %v1064_v34 }
 0x131   : > { %v1065_v33 = vpop.f32.mrf.mxu1 }
 0x132   : > { %v1241_v31 = vpop.f32.mrf.mxu3  ;;  %v1066_v43 = vadd.f32 %v1065_v33, %v2511_v3 }
 0x133   : > { %v1242_v58 = vadd.f32 %v1241_v31, %v1153_v42 }
 0x137   : > { %v1154_v48 = vpop.f32.mrf.mxu2 }
 0x138   : > { %v1155_v50 = vadd.f32 %v1154_v48, %v1066_v43 }
 0x139   : > { %v1068_v57 = vpop.f32.mrf.mxu1 }
 0x13a   : > { %v1243_v52 = vpop.f32.mrf.mxu3  ;;  %v1069_v5 = vadd.f32 %v1068_v57, %v2526_v15  ;;  %v1927_v15 = vor.u32 %v2196_v14, %v1924_v16 }
 0x13b   : > { %v1244_v59 = vadd.f32 %v1243_v52, %v1155_v50 }
 0x13c   : > { %1107 = vmatmul.bf16.gmra.mxu1 %v1903_v55  ;;  %1196 = vmatmul.bf16.gmra.mxu2 %v1907_v56  ;;  %v1935_v55 = vor.u32 %v2199_v38, %v1932_v39  ;;  %v1939_v56 = vor.u32 %v2202_v41, %v1938_v40 }
 0x13d   : > { %v1404_v3 = vpack.c.bf16 %v1244_v59, %v1242_v58 }
 0x13f   : > { %1285 = vmatmul.bf16.gmra.mxu3 %v1911_v62  ;;  %1512 = vmatmul.bf16.gmra.mxu0 %v1404_v3  ;;  %v1157_v60 = vpop.f32.mrf.mxu2  ;;  %v1943_v62 = vor.u32 %v2200_v44, %v1940_v47 }
 0x140   : > { %v1158_v10 = vadd.f32 %v1157_v60, %v1069_v5 }
 0x141   : > { %v1070_v4 = vpop.f32.mrf.mxu1 }
 0x142   : > { %v1246_v0 = vpop.f32.mrf.mxu3  ;;  %v1071_v13 = vadd.f32 %v1070_v4, %v2535_v20 }
 0x143   : > { %v1247_v26 = vadd.f32 %v1246_v0, %v1158_v10 }
 0x147   : > { %v1159_v17 = vpop.f32.mrf.mxu2 }
 0x148   : > { %v1160_v21 = vadd.f32 %v1159_v17, %v1071_v13 }
 0x149   : > { %v1073_v25 = vpop.f32.mrf.mxu1 }
 0x14a   : > { %v1248_v22 = vpop.f32.mrf.mxu3  ;;  %v1074_v34 = vadd.f32 %v1073_v25, %v2550_v32 }
 0x14b   : > { %v1249_v27 = vadd.f32 %v1248_v22, %v1160_v21 }
 0x14c   : > { %1112 = vmatmul.bf16.gmra.mxu1 %v1919_v23  ;;  %1201 = vmatmul.bf16.gmra.mxu2 %v1923_v24 }
 0x14d   : > { %v1405_v20 = vpack.c.bf16 %v1249_v27, %v1247_v26 }
 0x14f   : > { %1290 = vmatmul.bf16.gmra.mxu3 %v1927_v15  ;;  %1517 = vmatmul.bf16.gmra.mxu0 %v1405_v20  ;;  %v1162_v30 = vpop.f32.mrf.mxu2  ;;  %v2648_v15 = vld [vmem:[%s2745_s3] ss:$0 sm:$0xff] }
 0x150   : > { %v1163_v42 = vadd.f32 %v1162_v30, %v1074_v34 }
 0x151   : > { %v1075_v33 = vpop.f32.mrf.mxu1 }
 0x152   : > { %v1251_v31 = vpop.f32.mrf.mxu3  ;;  %v1076_v43 = vadd.f32 %v1075_v33, %v2559_v37 }
 0x153   : > { %v1252_v58 = vadd.f32 %v1251_v31, %v1163_v42 }
 0x157   : > { %v1164_v48 = vpop.f32.mrf.mxu2 }
 0x158   : > { %v1165_v50 = vadd.f32 %v1164_v48, %v1076_v43 }
 0x159   : > { %v1078_v57 = vpop.f32.mrf.mxu1 }
 0x15a   : > { %v1253_v52 = vpop.f32.mrf.mxu3  ;;  %v1079_v37 = vadd.f32 %v1078_v57, %v2574_v49 }
 0x15b   : > { %v1254_v59 = vadd.f32 %v1253_v52, %v1165_v50 }
 0x15c   : > { %1117 = vmatmul.bf16.gmra.mxu1 %v1935_v55  ;;  %1206 = vmatmul.bf16.gmra.mxu2 %v1939_v56 }
 0x15d   : > { %v1406_v32 = vpack.c.bf16 %v1254_v59, %v1252_v58 }
 0x15f   : > { %1295 = vmatmul.bf16.gmra.mxu3 %v1943_v62  ;;  %1522 = vmatmul.bf16.gmra.mxu0 %v1406_v32  ;;  %v1167_v3 = vpop.f32.mrf.mxu2 }
 0x160   : > { %v1168_v4 = vadd.f32 %v1167_v3, %v1079_v37 }
 0x161   : > { %v1080_v0 = vpop.f32.mrf.mxu1 }
 0x162   : > { %v1256_v60 = vpop.f32.mrf.mxu3  ;;  %v1081_v5 = vadd.f32 %v1080_v0, %v2580_v54 }
 0x163   : > { %v1257_v10 = vadd.f32 %v1256_v60, %v1168_v4 }
 0x167   : > { %v1169_v6 = vpop.f32.mrf.mxu2 }
 0x168   : > { %v1170_v7 = vadd.f32 %v1169_v6, %v1081_v5 }
 0x169   : > { %v1083_v9 = vpop.f32.mrf.mxu1 }
 0x16a   : > { %v1258_v8 = vpop.f32.mrf.mxu3  ;;  %v1084_v22 = vadd.f32 %v1083_v9, %v2507_v1 }
 0x16b   : > { %v1259_v13 = vadd.f32 %v1258_v8, %v1170_v7 }
 0x16d   : > { %v1407_v14 = vpack.c.bf16 %v1259_v13, %v1257_v10 }
 0x16f   : > { %1527 = vmatmul.bf16.gmra.mxu0 %v1407_v14  ;;  %v1172_v16 = vpop.f32.mrf.mxu2 }
 0x170   : > { %v1173_v23 = vadd.f32 %v1172_v16, %v1084_v22 }
 0x171   : > { %v1085_v21 = vpop.f32.mrf.mxu1 }
 0x172   : > { %v1261_v17 = vpop.f32.mrf.mxu3  ;;  %v1086_v49 = vadd.f32 %v1085_v21, %v2522_v11 }
 0x173   : > { %v1262_v27 = vadd.f32 %v1261_v17, %v1173_v23 }
 0x177   : > { %v1174_v24 = vpop.f32.mrf.mxu2 }
 0x178   : > { %v1175_v25 = vadd.f32 %v1174_v24, %v1086_v49 }
 0x179   : > { %v1088_v26 = vpop.f32.mrf.mxu1 }
 0x17a   : > { %v1263_v54 = vpop.f32.mrf.mxu3  ;;  %v1089_v39 = vadd.f32 %v1088_v26, %v2531_v18 }
 0x17b   : > { %v1264_v20 = vadd.f32 %v1263_v54, %v1175_v25 }
 0x17c   : > { %v1493_v1 = vpop.f32.mrf.mxu0 }
 0x17d   : > { %v1408_v11 = vpack.c.bf16 %v1264_v20, %v1262_v27  ;;  %v1494_v30 = vadd.f32 %v2648_v15, %v1493_v1 }
 0x17f   : > { %1573 = vst [vmem:[%s2653_s22] sm:$0xff] %v1494_v30  ;;  %1532 = vmatmul.bf16.gmra.mxu0 %v1408_v11  ;;  %v1177_v31 = vpop.f32.mrf.mxu2 }
 0x180   : > { %v1178_v41 = vadd.f32 %v1177_v31, %v1089_v39 }
 0x181   : > { %v1090_v34 = vpop.f32.mrf.mxu1 }
 0x182   : > { %v1266_v33 = vpop.f32.mrf.mxu3  ;;  %v1091_v42 = vadd.f32 %v1090_v34, %v2546_v28 }
 0x183   : > { %v1267_v50 = vadd.f32 %v1266_v33, %v1178_v41 }
 0x184   : > { %v1495_v38 = vpop.f32.mrf.mxu0 }
 0x185   : > { %v1496_v40 = vadd.f32 %v2648_v15, %v1495_v38 }
 0x187   : > { %1574 = vst [vmem:[%s2653_s22 + $0x8] sm:$0xff] %v1496_v40  ;;  %v1179_v43 = vpop.f32.mrf.mxu2 }
 0x188   : > { %v1180_v44 = vadd.f32 %v1179_v43, %v1091_v42 }
 0x189   : > { %v1093_v48 = vpop.f32.mrf.mxu1 }
 0x18a   : > { %v1268_v47 = vpop.f32.mrf.mxu3  ;;  %v1094_v28 = vadd.f32 %v1093_v48, %v2555_v35 }
 0x18b   : > { %v1269_v52 = vadd.f32 %v1268_v47, %v1180_v44 }
 0x18c   : > { %v1498_v55 = vpop.f32.mrf.mxu0 }
 0x18d   : > { %v1409_v56 = vpack.c.bf16 %v1269_v52, %v1267_v50  ;;  %v1499_v57 = vadd.f32 %v2648_v15, %v1498_v55 }
 0x18f   : > { %1575 = vst [vmem:[%s2653_s22 + $0x10] sm:$0xff] %v1499_v57  ;;  %1537 = vmatmul.bf16.gmra.mxu0 %v1409_v56  ;;  %v1182_v18 = vpop.f32.mrf.mxu2 }
 0x190   : > { %v1183_v3 = vadd.f32 %v1182_v18, %v1094_v28 }
 0x191   : > { %v1095_v58 = vpop.f32.mrf.mxu1 }
 0x192   : > { %v1271_v62 = vpop.f32.mrf.mxu3  ;;  %v1096_v60 = vadd.f32 %v1095_v58, %v2570_v45 }
 0x193   : > { %v1272_v6 = vadd.f32 %v1271_v62, %v1183_v3 }
 0x194   : > { %v1500_v59 = vpop.f32.mrf.mxu0 }
 0x195   : > { %v1501_v32 = vadd.f32 %v2648_v15, %v1500_v59 }
 0x197   : > { %1576 = vst [vmem:[%s2653_s22 + $0x18] sm:$0xff] %v1501_v32  ;;  %v1184_v0 = vpop.f32.mrf.mxu2 }
 0x198   : > { %v1185_v37 = vadd.f32 %v1184_v0, %v1096_v60 }
 0x199   : > { %v1098_v5 = vpop.f32.mrf.mxu1 }
 0x19a   : > { %v1273_v4 = vpop.f32.mrf.mxu3  ;;  %v1099_v45 = vadd.f32 %v1098_v5, %v2576_v51 }
 0x19b   : > { %v1274_v7 = vadd.f32 %v1273_v4, %v1185_v37 }
 0x19c   : > { %v1503_v8 = vpop.f32.mrf.mxu0 }
 0x19d   : > { %v1410_v9 = vpack.c.bf16 %v1274_v7, %v1272_v6  ;;  %v1504_v10 = vadd.f32 %v2648_v15, %v1503_v8 }
 0x19f   : > { %1577 = vst [vmem:[%s2653_s22 + $0x20] sm:$0xff] %v1504_v10  ;;  %1542 = vmatmul.bf16.gmra.mxu0 %v1410_v9  ;;  %v1187_v35 = vpop.f32.mrf.mxu2 }
 0x1a0   : > { %v1188_v21 = vadd.f32 %v1187_v35, %v1099_v45 }
 0x1a1   : > { %v1100_v14 = vpop.f32.mrf.mxu1 }
 0x1a2   : > { %v1276_v13 = vpop.f32.mrf.mxu3  ;;  %v1101_v22 = vadd.f32 %v1100_v14, %v2588_v61 }
 0x1a3   : > { %v1277_v54 = vadd.f32 %v1276_v13, %v1188_v21 }
 0x1a4   : > { %v1505_v16 = vpop.f32.mrf.mxu0 }
 0x1a5   : > { %v1506_v17 = vadd.f32 %v2648_v15, %v1505_v16 }
 0x1a7   : > { %1578 = vst [vmem:[%s2653_s22 + $0x28] sm:$0xff] %v1506_v17  ;;  %v1189_v23 = vpop.f32.mrf.mxu2 }
 0x1a8   : > { %v1190_v49 = vadd.f32 %v1189_v23, %v1101_v22 }
 0x1a9   : > { %v1103_v25 = vpop.f32.mrf.mxu1 }
 0x1aa   : > { %v1278_v24 = vpop.f32.mrf.mxu3  ;;  %v1104_v61 = vadd.f32 %v1103_v25, %v2509_v2 }
 0x1ab   : > { %v1279_v26 = vadd.f32 %v1278_v24, %v1190_v49 }
 0x1ac   : > { %v1508_v27 = vpop.f32.mrf.mxu0 }
 0x1ad   : > { %v1411_v20 = vpack.c.bf16 %v1279_v26, %v1277_v54  ;;  %v1509_v1 = vadd.f32 %v2648_v15, %v1508_v27 }
 0x1af   : > { %1579 = vst [vmem:[%s2653_s22 + $0x30] sm:$0xff] %v1509_v1  ;;  %1547 = vmatmul.bf16.gmra.mxu0 %v1411_v20  ;;  %v1192_v51 = vpop.f32.mrf.mxu2 }
 0x1b0   : > { %v1193_v34 = vadd.f32 %v1192_v51, %v1104_v61 }
 0x1b1   : > { %v1105_v30 = vpop.f32.mrf.mxu1 }
 0x1b2   : > { %v1281_v11 = vpop.f32.mrf.mxu3  ;;  %v1106_v38 = vadd.f32 %v1105_v30, %v2524_v12 }
 0x1b3   : > { %v1282_v43 = vadd.f32 %v1281_v11, %v1193_v34 }
 0x1b4   : > { %v1510_v31 = vpop.f32.mrf.mxu0 }
 0x1b5   : > { %v1511_v33 = vadd.f32 %v2648_v15, %v1510_v31 }
 0x1b7   : > { %1580 = vst [vmem:[%s2653_s22 + $0x38] sm:$0xff] %v1511_v33  ;;  %v1194_v39 = vpop.f32.mrf.mxu2 }
 0x1b8   : > { %v1195_v40 = vadd.f32 %v1194_v39, %v1106_v38 }
 0x1b9   : > { %v1108_v42 = vpop.f32.mrf.mxu1 }
 0x1ba   : > { %v1283_v41 = vpop.f32.mrf.mxu3  ;;  %v1109_v12 = vadd.f32 %v1108_v42, %v2533_v19 }
 0x1bb   : > { %v1284_v44 = vadd.f32 %v1283_v41, %v1195_v40 }
 0x1bc   : > { %v1513_v47 = vpop.f32.mrf.mxu0 }
 0x1bd   : > { %v1412_v48 = vpack.c.bf16 %v1284_v44, %v1282_v43  ;;  %v1514_v50 = vadd.f32 %v2648_v15, %v1513_v47 }
 0x1bf   : > { %1581 = vst [vmem:[%s2653_s22 + $0x40] sm:$0xff] %v1514_v50  ;;  %1552 = vmatmul.bf16.gmra.mxu0 %v1412_v48  ;;  %v1197_v2 = vpop.f32.mrf.mxu2 }
 0x1c0   : > { %v1198_v18 = vadd.f32 %v1197_v2, %v1109_v12 }
 0x1c1   : > { %v1110_v55 = vpop.f32.mrf.mxu1 }
 0x1c2   : > { %v1286_v52 = vpop.f32.mrf.mxu3  ;;  %v1111_v62 = vadd.f32 %v1110_v55, %v2548_v29 }
 0x1c3   : > { %v1287_v3 = vadd.f32 %v1286_v52, %v1198_v18 }
 0x1c4   : > { %v1515_v56 = vpop.f32.mrf.mxu0 }
 0x1c5   : > { %v1516_v57 = vadd.f32 %v2648_v15, %v1515_v56 }
 0x1c7   : > { %1582 = vst [vmem:[%s2653_s22 + $0x48] sm:$0xff] %v1516_v57  ;;  %v1199_v58 = vpop.f32.mrf.mxu2 }
 0x1c8   : > { %v1200_v59 = vadd.f32 %v1199_v58, %v1111_v62 }
 0x1c9   : > { %v1113_v32 = vpop.f32.mrf.mxu1 }
 0x1ca   : > { %v1288_v28 = vpop.f32.mrf.mxu3  ;;  %v1114_v29 = vadd.f32 %v1113_v32, %v2557_v36 }
 0x1cb   : > { %v1289_v60 = vadd.f32 %v1288_v28, %v1200_v59 }
 0x1cc   : > { %v1518_v0 = vpop.f32.mrf.mxu0 }
 0x1cd   : > { %v1413_v37 = vpack.c.bf16 %v1289_v60, %v1287_v3  ;;  %v1519_v4 = vadd.f32 %v2648_v15, %v1518_v0 }
 0x1cf   : > { %1583 = vst [vmem:[%s2653_s22 + $0x50] sm:$0xff] %v1519_v4  ;;  %1557 = vmatmul.bf16.gmra.mxu0 %v1413_v37  ;;  %v1202_v19 = vpop.f32.mrf.mxu2 }
 0x1d0   : > { %v1203_v9 = vadd.f32 %v1202_v19, %v1114_v29 }
 0x1d1   : > { %v1115_v6 = vpop.f32.mrf.mxu1 }
 0x1d2   : > { %v1291_v5 = vpop.f32.mrf.mxu3  ;;  %v1116_v10 = vadd.f32 %v1115_v6, %v2572_v46 }
 0x1d3   : > { %v1292_v45 = vadd.f32 %v1291_v5, %v1203_v9 }
 0x1d4   : > { %v1520_v7 = vpop.f32.mrf.mxu0 }
 0x1d5   : > { %v1521_v8 = vadd.f32 %v2648_v15, %v1520_v7 }
 0x1d7   : > { %1584 = vst [vmem:[%s2653_s22 + $0x58] sm:$0xff] %v1521_v8  ;;  %v1204_v35 = vpop.f32.mrf.mxu2 }
 0x1d8   : > { %v1205_v13 = vadd.f32 %v1204_v35, %v1116_v10 }
 0x1d9   : > { %v1118_v16 = vpop.f32.mrf.mxu1 }
 0x1da   : > { %v1293_v14 = vpop.f32.mrf.mxu3  ;;  %v1119_v46 = vadd.f32 %v1118_v16, %v2578_v53 }
 0x1db   : > { %v1294_v17 = vadd.f32 %v1293_v14, %v1205_v13 }
 0x1dc   : > { %v1523_v21 = vpop.f32.mrf.mxu0 }
 0x1dd   : > { %v1414_v22 = vpack.c.bf16 %v1294_v17, %v1292_v45  ;;  %v1524_v23 = vadd.f32 %v2648_v15, %v1523_v21 }
 0x1df   : > { %1585 = vst [vmem:[%s2653_s22 + $0x60] sm:$0xff] %v1524_v23  ;;  %1562 = vmatmul.bf16.gmra.mxu0 %v1414_v22  ;;  %v1207_v36 = vpop.f32.mrf.mxu2 }
 0x1e0   : > { %v1208_v26 = vadd.f32 %v1207_v36, %v1119_v46 }
 0x1e1   : > { %v1120_v24 = vpop.f32.mrf.mxu1 }
 0x1e2   : > { %v1296_v49 = vpop.f32.mrf.mxu3  ;;  %v1121_v27 = vadd.f32 %v1120_v24, %v2590_v63 }
 0x1e3   : > { %v1297_v11 = vadd.f32 %v1296_v49, %v1208_v26 }
 0x1e4   : > { %v1525_v25 = vpop.f32.mrf.mxu0 }
 0x1e5   : > { %v1526_v54 = vadd.f32 %v2648_v15, %v1525_v25 }
 0x1e7   : > { %1586 = vst [vmem:[%s2653_s22 + $0x68] sm:$0xff] %v1526_v54  ;;  %v1209_v20 = vpop.f32.mrf.mxu2 }
 0x1e8   : > { %v1210_v1 = vadd.f32 %v1209_v20, %v1121_v27 }
 0x1ea   : > { %v1298_v51 = vpop.f32.mrf.mxu3 }
 0x1eb   : > { %v1299_v30 = vadd.f32 %v1298_v51, %v1210_v1 }
 0x1ec   : > { %v1528_v31 = vpop.f32.mrf.mxu0 }
 0x1ed   : > { %v1415_v61 = vpack.c.bf16 %v1299_v30, %v1297_v11  ;;  %v1529_v33 = vadd.f32 %v2648_v15, %v1528_v31 }
 0x1ef   : > { %1587 = vst [vmem:[%s2653_s22 + $0x70] sm:$0xff] %v1529_v33  ;;  %1567 = vmatmul.bf16.gmra.mxu0 %v1415_v61 }
 0x1f4   : > { %v1530_v53 = vpop.f32.mrf.mxu0 }
 0x1f5   : > { %v1531_v34 = vadd.f32 %v2648_v15, %v1530_v53 }
 0x1f7   : > { %1588 = vst [vmem:[%s2653_s22 + $0x78] sm:$0xff] %v1531_v34 }
 0x1fc   : > { %v1533_v63 = vpop.f32.mrf.mxu0 }
 0x1fd   : > { %v1534_v38 = vadd.f32 %v2648_v15, %v1533_v63 }
 0x1ff   : > { %1589 = vst [vmem:[%s2653_s22 + $0x80] sm:$0xff] %v1534_v38 }
 0x204   : > { %v1535_v39 = vpop.f32.mrf.mxu0 }
 0x205   : > { %v1536_v40 = vadd.f32 %v2648_v15, %v1535_v39 }
 0x207   : > { %1590 = vst [vmem:[%s2653_s22 + $0x88] sm:$0xff] %v1536_v40 }
 0x20c   : > { %v1538_v41 = vpop.f32.mrf.mxu0 }
 0x20d   : > { %v1539_v42 = vadd.f32 %v2648_v15, %v1538_v41 }
 0x20f   : > { %1591 = vst [vmem:[%s2653_s22 + $0x90] sm:$0xff] %v1539_v42 }
 0x214   : > { %v1540_v43 = vpop.f32.mrf.mxu0 }
 0x215   : > { %v1541_v44 = vadd.f32 %v2648_v15, %v1540_v43 }
 0x217   : > { %1592 = vst [vmem:[%s2653_s22 + $0x98] sm:$0xff] %v1541_v44 }
 0x21c   : > { %v1543_v47 = vpop.f32.mrf.mxu0 }
 0x21d   : > { %v1544_v48 = vadd.f32 %v2648_v15, %v1543_v47 }
 0x21f   : > { %1593 = vst [vmem:[%s2653_s22 + $0xa0] sm:$0xff] %v1544_v48 }
 0x224   : > { %v1545_v50 = vpop.f32.mrf.mxu0 }
 0x225   : > { %v1546_v2 = vadd.f32 %v2648_v15, %v1545_v50 }
 0x227   : > { %1594 = vst [vmem:[%s2653_s22 + $0xa8] sm:$0xff] %v1546_v2 }
 0x22c   : > { %v1548_v52 = vpop.f32.mrf.mxu0 }
 0x22d   : > { %v1549_v55 = vadd.f32 %v2648_v15, %v1548_v52 }
 0x22f   : > { %1595 = vst [vmem:[%s2653_s22 + $0xb0] sm:$0xff] %v1549_v55 }
 0x234   : > { %v1550_v56 = vpop.f32.mrf.mxu0 }
 0x235   : > { %v1551_v12 = vadd.f32 %v2648_v15, %v1550_v56 }
 0x237   : > { %1596 = vst [vmem:[%s2653_s22 + $0xb8] sm:$0xff] %v1551_v12 }
 0x23c   : > { %v1553_v57 = vpop.f32.mrf.mxu0 }
 0x23d   : > { %v1554_v18 = vadd.f32 %v2648_v15, %v1553_v57 }
 0x23f   : > { %1597 = vst [vmem:[%s2653_s22 + $0xc0] sm:$0xff] %v1554_v18 }
 0x244   : > { %v1555_v62 = vpop.f32.mrf.mxu0 }
 0x245   : > { %v1556_v58 = vadd.f32 %v2648_v15, %v1555_v62 }
 0x247   : > { %1598 = vst [vmem:[%s2653_s22 + $0xc8] sm:$0xff] %v1556_v58 }
 0x24c   : > { %v1558_v59 = vpop.f32.mrf.mxu0 }
 0x24d   : > { %v1559_v28 = vadd.f32 %v2648_v15, %v1558_v59 }
 0x24f   : > { %1599 = vst [vmem:[%s2653_s22 + $0xd0] sm:$0xff] %v1559_v28 }
 0x254   : > { %v1560_v32 = vpop.f32.mrf.mxu0 }
 0x255   : > { %v1561_v3 = vadd.f32 %v2648_v15, %v1560_v32 }
 0x257   : > { %1600 = vst [vmem:[%s2653_s22 + $0xd8] sm:$0xff] %v1561_v3 }
 0x25c   : > { %v1563_v60 = vpop.f32.mrf.mxu0 }
 0x25d   : > { %v1564_v0 = vadd.f32 %v2648_v15, %v1563_v60 }
 0x25f   : > { %1601 = vst [vmem:[%s2653_s22 + $0xe0] sm:$0xff] %v1564_v0 }
 0x264   : > { %v1565_v37 = vpop.f32.mrf.mxu0 }
 0x265   : > { %v1566_v4 = vadd.f32 %v2648_v15, %v1565_v37 }
 0x267   : > { %1602 = vst [vmem:[%s2653_s22 + $0xe8] sm:$0xff] %v1566_v4 }
 0x26c   : > { %v1568_v19 = vpop.f32.mrf.mxu0 }
 0x26d   : > { %v1569_v5 = vadd.f32 %v2648_v15, %v1568_v19 }
 0x26f   : > { %1603 = vst [vmem:[%s2653_s22 + $0xf0] sm:$0xff] %v1569_v5 }
 0x274   : > { %v1570_v6 = vpop.f32.mrf.mxu0 }
 0x275   : > { %v1571_v7 = vadd.f32 %v2648_v15, %v1570_v6 }
 0x277   : > { %1604 = vst [vmem:[%s2653_s22 + $0xf8] sm:$0xff] %v1571_v7 }
 0x278 PF: > { %s14_s17 = sadd.s32 1, %s2282_s17   ;;  %s2747_s15 = smov %s2278_s16 }
 0x279   : > { %p11_p5 = scmp.ge.s32.totalorder %s14_s17, 4   ;;  %s2748_s16 = smov %s2750_s18 }
 0x27b   :  { %13 = sbr.rel (!%p11_p5) target bundleno = 2 (0x2), region = 75 }

// kernel: generator_forward.2
= control target key start
LH: loop header
LB: loop body
LE: loop exit
PB: predicated region body
PF: predicated region fallthrough
CT: control target
= control target key end

     0   :  { %s2468_s15 = smov 0   ;;  %s2470_s16 = smov 0   ;;  %s2885_s0 = inlined_call_operand.vmem [shape: bf16[512,512], index: 0, kind: input, shape index: {}]   ;;  %s2886_s1 = inlined_call_operand.vmem [shape: bf16[512,128], index: 1, kind: input, shape index: {}]   ;;  %s2887_s2 = inlined_call_operand.vmem [shape: bf16[128,128], index: 2, kind: input, shape index: {}]   ;;  %s2888_s3 = inlined_call_operand.vmem [shape: f32[1,128], index: 3, kind: input, shape index: {}]   ;;  %s2889_s4 = inlined_call_operand.vmem [shape: bf16[512,128], index: 4, kind: output, shape index: {}]  }
   0x1   :  { %s2472_s17 = smov 0  }
   0x2 LB: > { %s26_s18 = sadd.s32 1, %s2437_s16  ;;  %p1746_p0 = scmp.ge.s32.totalorder %s2441_s17, 1  ;;  %s2441_s17 = sphi %s2472_s17, %s14_s17   ;;  %s2437_s16 = sphi %s2470_s16, %s2891_s16   ;;  %s2433_s15 = sphi %s2468_s15, %s2890_s15  }
   0x3   : > { %p28_p1 = scmp.ge.s32.totalorder %s26_s18, 2  ;;  %p183_p2 = scmp.lt.s32.totalorder %s2441_s17, 3 }
   0x5   : > { %s2893_s18 = smov (%p28_p1, %s26_s18), 0  ;;  %p184_p3 = pnand %p1746_p0, %p183_p2 }
   0x6   : > { %s1747_s25 = sshll.u32 (!%p184_p3), %s2433_s15, 5 }
   0x7   : > { %187 = sbr.rel (%p184_p3) target bundleno = 636 (0x27c), region = 36  ;;  %p216_p4 = scmp.lt.s32.totalorder (!%p184_p3), %s1747_s25, 63 }
   0xc   : > { %v2178_v0 = vld [vmem:[%s2886_s1 + $0x38] sm:$0xff]  ;;  %v2177_v1 = vld [vmem:[%s2886_s1 + $0x30] sm:$0xff]  ;;  %v2176_v2 = vld [vmem:[%s2886_s1 + $0x28] sm:$0xff]  ;;  %s2895_s25 = smov (!%p216_p4, %s1747_s25), 63 }
   0xd   : > { %2370 = vmatpush.bf16.msra.mxu1 %v2178_v0  ;;  %2371 = vmatpush.bf16.msra.mxu2 %v2178_v0  ;;  %v2175_v3 = vld [vmem:[%s2886_s1 + $0x20] sm:$0xff]  ;;  %v2174_v4 = vld [vmem:[%s2886_s1 + $0x18] sm:$0xff]  ;;  %v2173_v5 = vld [vmem:[%s2886_s1 + $0x10] sm:$0xff]  ;;  %s2170_s6 = sshll.u32 %s2895_s25, 4  ;;  %s1751_s19 = sshll.u32 %s2895_s25, 2 }
   0xe   : > { %2372 = vmatpush.bf16.msra.mxu3 %v2178_v0  ;;  %945 = vmatpush.bf16.msra.mxu0 %v2178_v0  ;;  %v2172_v6 = vld [vmem:[%s2886_s1 + $0x8] sm:$0xff]  ;;  %s2516_s11 = scalar_lea.vmem %s2885_s0, %s2170_s6  ;;  %v2171_v7 = vld [vmem:[%s2886_s1] sm:$0xff]  ;;  %v2194_v14 = vld [vmem:[%s2886_s1 + $0xb8] sm:$0xff]  ;;  %s2816_s22 = scalar_lea.vmem %s2889_s4, %s1751_s19 }
   0xf   : > { %v1818_v8 = vld [vmem:[%s2516_s11 + $0x80] sm:$0xf]  ;;  %v2221_v9 = vld [vmem:[%s2516_s11 + $0x8c] sm:$0xf0]  ;;  %v2202_v15 = vld [vmem:[%s2886_s1 + $0xf8] sm:$0xff] }
  0x10   : > { %v1882_v10 = vld [vmem:[%s2516_s11 + $0x100] sm:$0xf]  ;;  %v2237_v11 = vld [vmem:[%s2516_s11 + $0x10c] sm:$0xf0]  ;;  %v2186_v16 = vld [vmem:[%s2886_s1 + $0x78] sm:$0xff]  ;;  %v1819_v17 = vor.u32 %v2221_v9, %v1818_v8 }
  0x11   : > { %2373 = vmatpush.bf16.msra.mxu1 %v2177_v1  ;;  %2374 = vmatpush.bf16.msra.mxu2 %v2177_v1  ;;  %v1946_v12 = vld [vmem:[%s2516_s11 + $0x180] sm:$0xf]  ;;  %v2253_v13 = vld [vmem:[%s2516_s11 + $0x18c] sm:$0xf0]  ;;  %v1883_v18 = vor.u32 %v2237_v11, %v1882_v10  ;;  %v2192_v23 = vld [vmem:[%s2886_s1 + $0xa8] sm:$0xff] }
  0x12   : > { %2375 = vmatpush.bf16.msra.mxu3 %v2177_v1  ;;  %946 = vmatpush.bf16.msra.mxu0 %v2177_v1  ;;  %v1947_v19 = vor.u32 %v2253_v13, %v1946_v12  ;;  %v2193_v20 = vld [vmem:[%s2886_s1 + $0xb0] sm:$0xff]  ;;  %v2200_v24 = vld [vmem:[%s2886_s1 + $0xe8] sm:$0xff]  ;;  %v2191_v26 = vld [vmem:[%s2886_s1 + $0xa0] sm:$0xff] }
  0x13   : > { %v2201_v21 = vld [vmem:[%s2886_s1 + $0xf0] sm:$0xff]  ;;  %v2184_v25 = vld [vmem:[%s2886_s1 + $0x68] sm:$0xff]  ;;  %v2199_v27 = vld [vmem:[%s2886_s1 + $0xe0] sm:$0xff] }
  0x14   : > { %v2185_v22 = vld [vmem:[%s2886_s1 + $0x70] sm:$0xff]  ;;  %v2183_v28 = vld [vmem:[%s2886_s1 + $0x60] sm:$0xff]  ;;  %v2190_v35 = vld [vmem:[%s2886_s1 + $0x98] sm:$0xff] }
  0x15   : > { %2376 = vmatpush.bf16.msra.mxu1 %v2176_v2  ;;  %2377 = vmatpush.bf16.msra.mxu2 %v2176_v2  ;;  %v1834_v29 = vld [vmem:[%s2516_s11 + $0xa0] sm:$0xf]  ;;  %v2225_v30 = vld [vmem:[%s2516_s11 + $0xac] sm:$0xf0]  ;;  %v2198_v36 = vld [vmem:[%s2886_s1 + $0xd8] sm:$0xff] }
  0x16   : > { %2378 = vmatpush.bf16.msra.mxu3 %v2176_v2  ;;  %947 = vmatpush.bf16.msra.mxu0 %v2176_v2  ;;  %v1898_v31 = vld [vmem:[%s2516_s11 + $0x120] sm:$0xf]  ;;  %v2241_v32 = vld [vmem:[%s2516_s11 + $0x12c] sm:$0xf0]  ;;  %v2182_v37 = vld [vmem:[%s2886_s1 + $0x58] sm:$0xff]  ;;  %v1835_v38 = vor.u32 %v2225_v30, %v1834_v29 }
  0x17   : > { %v1962_v33 = vld [vmem:[%s2516_s11 + $0x1a0] sm:$0xf]  ;;  %v2257_v34 = vld [vmem:[%s2516_s11 + $0x1ac] sm:$0xf0]  ;;  %v1899_v39 = vor.u32 %v2241_v32, %v1898_v31  ;;  %v2188_v44 = vld [vmem:[%s2886_s1 + $0x88] sm:$0xff] }
  0x18   : > { %v1963_v40 = vor.u32 %v2257_v34, %v1962_v33  ;;  %v2189_v41 = vld [vmem:[%s2886_s1 + $0x90] sm:$0xff]  ;;  %v1754_v45 = vld [vmem:[%s2516_s11] sm:$0xf]  ;;  %v2196_v46 = vld [vmem:[%s2886_s1 + $0xc8] sm:$0xff] }
  0x19   : > { %2379 = vmatpush.bf16.msra.mxu1 %v2175_v3  ;;  %2380 = vmatpush.bf16.msra.mxu2 %v2175_v3  ;;  %v2197_v42 = vld [vmem:[%s2886_s1 + $0xd0] sm:$0xff]  ;;  %v2180_v47 = vld [vmem:[%s2886_s1 + $0x48] sm:$0xff]  ;;  %v2187_v50 = vld [vmem:[%s2886_s1 + $0x80] sm:$0xff] }
  0x1a   : > { %2381 = vmatpush.bf16.msra.mxu3 %v2175_v3  ;;  %948 = vmatpush.bf16.msra.mxu0 %v2175_v3  ;;  %v2181_v43 = vld [vmem:[%s2886_s1 + $0x50] sm:$0xff]  ;;  %v2195_v51 = vld [vmem:[%s2886_s1 + $0xc0] sm:$0xff]  ;;  %v2208_v29 = vld [vmem:[%s2516_s11 + $0x2c] sm:$0xf] }
  0x1b   : > { %v2205_v48 = vld [vmem:[%s2516_s11 + $0xc] sm:$0xf0]  ;;  %v2179_v52 = vld [vmem:[%s2886_s1 + $0x40] sm:$0xff]  ;;  %v1780_v30 = vld [vmem:[%s2516_s11 + $0x38] sm:$0xf0] }
  0x1c   : > { %v1755_v49 = vor.u32 %v2205_v48, %v1754_v45  ;;  %v1850_v53 = vld [vmem:[%s2516_s11 + $0xc0] sm:$0xf]  ;;  %v2229_v54 = vld [vmem:[%s2516_s11 + $0xcc] sm:$0xf0]  ;;  %v2203_v13 = vld [vmem:[%s2516_s11 + $0x4] sm:$0xf]  ;;  %v1783_v33 = vor.u32 %v2208_v29, %v1780_v30 }
  0x1d   : > { %2382 = vmatpush.bf16.msra.mxu1 %v2174_v4  ;;  %2383 = vmatpush.bf16.msra.mxu2 %v2174_v4  ;;  %v1914_v55 = vld [vmem:[%s2516_s11 + $0x140] sm:$0xf]  ;;  %v2245_v56 = vld [vmem:[%s2516_s11 + $0x14c] sm:$0xf0]  ;;  %v1851_v59 = vor.u32 %v2229_v54, %v1850_v53  ;;  %v2211_v34 = vld [vmem:[%s2516_s11 + $0x44] sm:$0xf] }
  0x1e   : > { %2384 = vmatpush.bf16.msra.mxu3 %v2174_v4  ;;  %949 = vmatpush.bf16.msra.mxu0 %v2174_v4  ;;  %v1978_v57 = vld [vmem:[%s2516_s11 + $0x1c0] sm:$0xf]  ;;  %v2261_v58 = vld [vmem:[%s2516_s11 + $0x1cc] sm:$0xf0]  ;;  %v1915_v60 = vor.u32 %v2245_v56, %v1914_v55  ;;  %v1810_v45 = vld [vmem:[%s2516_s11 + $0x68] sm:$0xf] }
  0x1f   : > { %v1979_v61 = vor.u32 %v2261_v58, %v1978_v57  ;;  %v1770_v62 = vld [vmem:[%s2516_s11 + $0x20] sm:$0xf]  ;;  %v2209_v63 = vld [vmem:[%s2516_s11 + $0x2c] sm:$0xf0]  ;;  %v1812_v48 = vld [vmem:[%s2516_s11 + $0x78] sm:$0xf0] }
  0x20   : > { %v1771_v0 = vor.u32 %v2209_v63, %v1770_v62  ;;  %v1866_v1 = vld [vmem:[%s2516_s11 + $0xe0] sm:$0xf]  ;;  %v2233_v2 = vld [vmem:[%s2516_s11 + $0xec] sm:$0xf0]  ;;  %v2219_v54 = vld [vmem:[%s2516_s11 + $0x84] sm:$0xf] }
  0x21   : > { %2385 = vmatpush.bf16.msra.mxu1 %v2173_v5  ;;  %2386 = vmatpush.bf16.msra.mxu2 %v2173_v5  ;;  %v1930_v3 = vld [vmem:[%s2516_s11 + $0x160] sm:$0xf]  ;;  %v2249_v4 = vld [vmem:[%s2516_s11 + $0x16c] sm:$0xf0]  ;;  %v1820_v55 = vld [vmem:[%s2516_s11 + $0x90] sm:$0xf0] }
  0x22   : > { %2387 = vmatpush.bf16.msra.mxu3 %v2173_v5  ;;  %950 = vmatpush.bf16.msra.mxu0 %v2173_v5  ;;  %v1994_v5 = vld [vmem:[%s2516_s11 + $0x1e0] sm:$0xf]  ;;  %v1931_v8 = vor.u32 %v2249_v4, %v1930_v3  ;;  %v2213_v11 = vld [vmem:[%s2516_s11 + $0x4c] sm:$0xf0]  ;;  %v1826_v56 = vld [vmem:[%s2516_s11 + $0x88] sm:$0xf] }
  0x23   : > { %v1786_v10 = vld [vmem:[%s2516_s11 + $0x40] sm:$0xf]  ;;  %v2273_v53 = vld [vmem:[%s2887_s2 + $0x30] sm:$0xff]  ;;  %v2222_v57 = vld [vmem:[%s2516_s11 + $0x94] sm:$0xf0] }
  0x24   : > { %v1787_v12 = vor.u32 %v2213_v11, %v1786_v10  ;;  %v2220_v58 = vld [vmem:[%s2516_s11 + $0x8c] sm:$0xf]  ;;  %v2271_v4 = vld [vmem:[%s2887_s2 + $0x20] sm:$0xff]  ;;  %v1844_v10 = vld [vmem:[%s2516_s11 + $0xb8] sm:$0xf0] }
  0x25   : > { %2388 = vmatpush.bf16.msra.mxu1 %v2172_v6  ;;  %2389 = vmatpush.bf16.msra.mxu2 %v2172_v6 }
  0x26   : > { %2390 = vmatpush.bf16.msra.mxu3 %v2172_v6  ;;  %951 = vmatpush.bf16.msra.mxu0 %v2172_v6  ;;  %v2265_v6 = vld [vmem:[%s2516_s11 + $0x1ec] sm:$0xf0] }
  0x27   : > { %v1995_v9 = vor.u32 %v2265_v6, %v1994_v5  ;;  %v2223_v5 = vld [vmem:[%s2516_s11 + $0xa4] sm:$0xf]  ;;  %v1836_v6 = vld [vmem:[%s2516_s11 + $0xb0] sm:$0xf0] }
  0x29   : > { %2391 = vmatpush.bf16.msra.mxu1 %v2171_v7  ;;  %2392 = vmatpush.bf16.msra.mxu2 %v2171_v7 }
  0x2a   : > { %2393 = vmatpush.bf16.msra.mxu3 %v2171_v7  ;;  %952 = vmatpush.bf16.msra.mxu0 %v2171_v7  ;;  %v1867_v7 = vor.u32 %v2233_v2, %v1866_v1 }
  0x2c   : > { %973 = vmatmul.bf16.vlgmr.msra.gmra.mxu1 %v1819_v17  ;;  %993 = vmatmul.bf16.vlgmr.msra.gmra.mxu2 %v1883_v18  ;;  %v2204_v17 = vld [vmem:[%s2516_s11 + $0xc] sm:$0xf]  ;;  %v1764_v18 = vld [vmem:[%s2516_s11 + $0x18] sm:$0xf0] }
  0x2d   : > { %1123 = vmatpush.bf16.msrb.mxu2 %v2194_v14  ;;  %1034 = vmatpush.bf16.msrb.mxu1 %v2186_v16  ;;  %v1756_v14 = vld [vmem:[%s2516_s11 + $0x10] sm:$0xf0]  ;;  %v2206_v16 = vld [vmem:[%s2516_s11 + $0x14] sm:$0xf0] }
  0x2e   : > { %1212 = vmatpush.bf16.msrb.mxu3 %v2202_v15  ;;  %953 = vmatmul.bf16.vlgmr.msra.gmra.mxu0 %v1755_v49  ;;  %v1762_v15 = vld [vmem:[%s2516_s11 + $0x8] sm:$0xf] }
  0x2f   : > { %1013 = vmatmul.bf16.vlgmr.msra.gmra.mxu3 %v1947_v19  ;;  %v1759_v19 = vor.u32 %v2203_v13, %v1756_v14  ;;  %v1839_v13 = vor.u32 %v2223_v5, %v1836_v6 }
  0x31   : > { %1124 = vmatpush.bf16.msrb.mxu2 %v2193_v20  ;;  %1035 = vmatpush.bf16.msrb.mxu1 %v2185_v22  ;;  %v1763_v20 = vor.u32 %v2206_v16, %v1762_v15  ;;  %v1802_v22 = vld [vmem:[%s2516_s11 + $0x60] sm:$0xf] }
  0x32   : > { %1213 = vmatpush.bf16.msrb.mxu3 %v2201_v21  ;;  %v1767_v21 = vor.u32 %v2204_v17, %v1764_v18  ;;  %v2270_v17 = vld [vmem:[%s2887_s2 + $0x18] sm:$0xff] }
  0x35   : > { %1125 = vmatpush.bf16.msrb.mxu2 %v2192_v23  ;;  %1036 = vmatpush.bf16.msrb.mxu1 %v2184_v25  ;;  %v2217_v23 = vld [vmem:[%s2516_s11 + $0x6c] sm:$0xf0]  ;;  %v2207_v25 = vld [vmem:[%s2516_s11 + $0x24] sm:$0xf] }
  0x36   : > { %1214 = vmatpush.bf16.msrb.mxu3 %v2200_v24  ;;  %v1803_v24 = vor.u32 %v2217_v23, %v1802_v22  ;;  %v2227_v22 = vld [vmem:[%s2516_s11 + $0xc4] sm:$0xf]  ;;  %v1852_v23 = vld [vmem:[%s2516_s11 + $0xd0] sm:$0xf0] }
  0x37   : > { %v1855_v30 = vor.u32 %v2227_v22, %v1852_v23  ;;  %v2242_v22 = vld [vmem:[%s2516_s11 + $0x134] sm:$0xf0] }
  0x39   : > { %1126 = vmatpush.bf16.msrb.mxu2 %v2191_v26  ;;  %1037 = vmatpush.bf16.msrb.mxu1 %v2183_v28  ;;  %v1772_v26 = vld [vmem:[%s2516_s11 + $0x30] sm:$0xf0]  ;;  %v2210_v28 = vld [vmem:[%s2516_s11 + $0x34] sm:$0xf0] }
  0x3a   : > { %1215 = vmatpush.bf16.msrb.mxu3 %v2199_v27  ;;  %v1778_v27 = vld [vmem:[%s2516_s11 + $0x28] sm:$0xf]  ;;  %v1775_v31 = vor.u32 %v2207_v25, %v1772_v26  ;;  %v2230_v25 = vld [vmem:[%s2516_s11 + $0xd4] sm:$0xf0]  ;;  %v2228_v26 = vld [vmem:[%s2516_s11 + $0xcc] sm:$0xf] }
  0x3b   : > { %v1779_v32 = vor.u32 %v2210_v28, %v1778_v27  ;;  %v1860_v27 = vld [vmem:[%s2516_s11 + $0xd8] sm:$0xf0] }
  0x3c   : > { %978 = vmatmul.bf16.gmra.mxu1 %v1835_v38  ;;  %998 = vmatmul.bf16.gmra.mxu2 %v1899_v39  ;;  %v2212_v38 = vld [vmem:[%s2516_s11 + $0x4c] sm:$0xf]  ;;  %v1796_v39 = vld [vmem:[%s2516_s11 + $0x58] sm:$0xf0] }
  0x3d   : > { %1127 = vmatpush.bf16.msrb.mxu2 %v2190_v35  ;;  %1038 = vmatpush.bf16.msrb.mxu1 %v2182_v37  ;;  %v1788_v35 = vld [vmem:[%s2516_s11 + $0x50] sm:$0xf0]  ;;  %v2214_v37 = vld [vmem:[%s2516_s11 + $0x54] sm:$0xf0] }
  0x3e   : > { %1216 = vmatpush.bf16.msrb.mxu3 %v2198_v36  ;;  %958 = vmatmul.bf16.gmra.mxu0 %v1771_v0  ;;  %v1794_v36 = vld [vmem:[%s2516_s11 + $0x48] sm:$0xf] }
  0x3f   : > { %1018 = vmatmul.bf16.gmra.mxu3 %v1963_v40  ;;  %v1791_v40 = vor.u32 %v2211_v34, %v1788_v35  ;;  %v2272_v0 = vld [vmem:[%s2887_s2 + $0x28] sm:$0xff] }
  0x40   : > { %v2268_v34 = vld [vmem:[%s2887_s2 + $0x8] sm:$0xff] }
  0x41   : > { %1128 = vmatpush.bf16.msrb.mxu2 %v2189_v41  ;;  %1039 = vmatpush.bf16.msrb.mxu1 %v2181_v43  ;;  %v1795_v41 = vor.u32 %v2214_v37, %v1794_v36  ;;  %v2215_v43 = vld [vmem:[%s2516_s11 + $0x64] sm:$0xf] }
  0x42   : > { %1217 = vmatpush.bf16.msrb.mxu3 %v2197_v42  ;;  %v1799_v42 = vor.u32 %v2212_v38, %v1796_v39  ;;  %v2267_v38 = vld [vmem:[%s2887_s2] sm:$0xff] }
  0x43   : > { %v2231_v39 = vld [vmem:[%s2516_s11 + $0xe4] sm:$0xf] }
  0x45   : > { %1129 = vmatpush.bf16.msrb.mxu2 %v2188_v44  ;;  %1040 = vmatpush.bf16.msrb.mxu1 %v2180_v47  ;;  %v1804_v44 = vld [vmem:[%s2516_s11 + $0x70] sm:$0xf0]  ;;  %v2216_v47 = vld [vmem:[%s2516_s11 + $0x6c] sm:$0xf] }
  0x46   : > { %1218 = vmatpush.bf16.msrb.mxu3 %v2196_v46  ;;  %v2218_v46 = vld [vmem:[%s2516_s11 + $0x74] sm:$0xf0]  ;;  %v1807_v49 = vor.u32 %v2215_v43, %v1804_v44  ;;  %v2232_v43 = vld [vmem:[%s2516_s11 + $0xec] sm:$0xf]  ;;  %v1876_v44 = vld [vmem:[%s2516_s11 + $0xf8] sm:$0xf0] }
  0x49   : > { %1130 = vmatpush.bf16.msrb.mxu2 %v2187_v50  ;;  %1041 = vmatpush.bf16.msrb.mxu1 %v2179_v52  ;;  %v1811_v50 = vor.u32 %v2218_v46, %v1810_v45  ;;  %v2274_v52 = vld [vmem:[%s2887_s2 + $0x38] sm:$0xff] }
  0x4a   : > { %1219 = vmatpush.bf16.msrb.mxu3 %v2195_v51  ;;  %v1815_v51 = vor.u32 %v2216_v47, %v1812_v48  ;;  %1484 = vmatpush.bf16.msrb.mxu0 %v2274_v52 }
  0x4c   : > { %983 = vmatmul.bf16.gmra.mxu1 %v1851_v59  ;;  %1003 = vmatmul.bf16.gmra.mxu2 %v1915_v60  ;;  %v1828_v59 = vld [vmem:[%s2516_s11 + $0x98] sm:$0xf0]  ;;  %v1823_v60 = vor.u32 %v2219_v54, %v1820_v55  ;;  %v2235_v55 = vld [vmem:[%s2516_s11 + $0x104] sm:$0xf] }
  0x4d   : > { %v1831_v63 = vor.u32 %v2220_v58, %v1828_v59  ;;  %v2238_v58 = vld [vmem:[%s2516_s11 + $0x114] sm:$0xf0]  ;;  %v2236_v59 = vld [vmem:[%s2516_s11 + $0x10c] sm:$0xf] }
  0x4e   : > { %963 = vmatmul.bf16.gmra.mxu0 %v1787_v12 }
  0x4f   : > { %1023 = vmatmul.bf16.gmra.mxu3 %v1979_v61  ;;  %1485 = vmatpush.bf16.msrb.mxu0 %v2273_v53  ;;  %v1827_v61 = vor.u32 %v2222_v57, %v1826_v56  ;;  %v1884_v56 = vld [vmem:[%s2516_s11 + $0x110] sm:$0xf0]  ;;  %v1890_v57 = vld [vmem:[%s2516_s11 + $0x108] sm:$0xf] }
  0x53   : > { %1486 = vmatpush.bf16.msrb.mxu0 %v2272_v0  ;;  %v1887_v0 = vor.u32 %v2235_v55, %v1884_v56  ;;  %v1916_v55 = vld [vmem:[%s2516_s11 + $0x150] sm:$0xf0]  ;;  %v1922_v56 = vld [vmem:[%s2516_s11 + $0x148] sm:$0xf] }
  0x57   : > { %1487 = vmatpush.bf16.msrb.mxu0 %v2271_v4  ;;  %v1891_v4 = vor.u32 %v2238_v58, %v1890_v57  ;;  %v2246_v57 = vld [vmem:[%s2516_s11 + $0x154] sm:$0xf0] }
  0x5b   : > { %1488 = vmatpush.bf16.msrb.mxu0 %v2270_v17  ;;  %v1900_v17 = vld [vmem:[%s2516_s11 + $0x130] sm:$0xf0] }
  0x5c   : > { %988 = vmatmul.bf16.gmra.mxu1 %v1867_v7  ;;  %1008 = vmatmul.bf16.gmra.mxu2 %v1931_v8  ;;  %v1842_v7 = vld [vmem:[%s2516_s11 + $0xa8] sm:$0xf]  ;;  %v2226_v8 = vld [vmem:[%s2516_s11 + $0xb4] sm:$0xf0] }
  0x5d   : > { %v1843_v14 = vor.u32 %v2226_v8, %v1842_v7 }
  0x5e   : > { %968 = vmatmul.bf16.gmra.mxu0 %v1803_v24  ;;  %v1858_v24 = vld [vmem:[%s2516_s11 + $0xc8] sm:$0xf] }
  0x5f   : > { %1028 = vmatmul.bf16.gmra.mxu3 %v1995_v9  ;;  %v2224_v9 = vld [vmem:[%s2516_s11 + $0xac] sm:$0xf] }
  0x60   : > { %v1847_v16 = vor.u32 %v2224_v9, %v1844_v10 }
  0x6c   : > { %1042 = vmatmul.bf16.vlgmr.msrb.gmra.mxu1 %v1759_v19  ;;  %1131 = vmatmul.bf16.vlgmr.msrb.gmra.mxu2 %v1763_v20 }
  0x6f   : > { %1220 = vmatmul.bf16.vlgmr.msrb.gmra.mxu3 %v1767_v21  ;;  %v2269_v21 = vld [vmem:[%s2887_s2 + $0x10] sm:$0xff] }
  0x70   : > { %1489 = vmatpush.bf16.msrb.mxu0 %v2269_v21  ;;  %v1906_v21 = vld [vmem:[%s2516_s11 + $0x128] sm:$0xf] }
  0x74   : > { %1490 = vmatpush.bf16.msrb.mxu0 %v2268_v34  ;;  %v1907_v34 = vor.u32 %v2242_v22, %v1906_v21 }
  0x78   : > { %1491 = vmatpush.bf16.msrb.mxu0 %v2267_v38 }
  0x7c   : > { %1047 = vmatmul.bf16.gmra.mxu1 %v1775_v31  ;;  %1136 = vmatmul.bf16.gmra.mxu2 %v1779_v32  ;;  %v1859_v31 = vor.u32 %v2230_v25, %v1858_v24  ;;  %v2240_v25 = vld [vmem:[%s2516_s11 + $0x12c] sm:$0xf] }
  0x7f   : > { %1225 = vmatmul.bf16.gmra.mxu3 %v1783_v33  ;;  %v1863_v33 = vor.u32 %v2228_v26, %v1860_v27  ;;  %v1908_v26 = vld [vmem:[%s2516_s11 + $0x138] sm:$0xf0] }
  0x8c   : > { %1052 = vmatmul.bf16.gmra.mxu1 %v1791_v40  ;;  %1141 = vmatmul.bf16.gmra.mxu2 %v1795_v41  ;;  %v1868_v40 = vld [vmem:[%s2516_s11 + $0xf0] sm:$0xf0]  ;;  %v1874_v41 = vld [vmem:[%s2516_s11 + $0xe8] sm:$0xf] }
  0x8d   : > { %v1871_v47 = vor.u32 %v2231_v39, %v1868_v40  ;;  %v1911_v39 = vor.u32 %v2240_v25, %v1908_v26  ;;  %v2247_v26 = vld [vmem:[%s2516_s11 + $0x164] sm:$0xf] }
  0x8f   : > { %1230 = vmatmul.bf16.gmra.mxu3 %v1799_v42  ;;  %v2234_v42 = vld [vmem:[%s2516_s11 + $0xf4] sm:$0xf0] }
  0x90   : > { %v1875_v48 = vor.u32 %v2234_v42, %v1874_v41 }
  0x9c   : > { %1057 = vmatmul.bf16.gmra.mxu1 %v1807_v49  ;;  %1146 = vmatmul.bf16.gmra.mxu2 %v1811_v50  ;;  %v1879_v50 = vor.u32 %v2232_v43, %v1876_v44 }
  0x9f   : > { %1235 = vmatmul.bf16.gmra.mxu3 %v1815_v51 }
  0xa9   : > { %v2661_v62 = vpop.f32.mrf.mxu1 }
  0xab   : > { %v954_v52 = vpop.f32.mrf.mxu0 }
  0xac   : > { %1062 = vmatmul.bf16.gmra.mxu1 %v1823_v60  ;;  %1151 = vmatmul.bf16.gmra.mxu2 %v1827_v61  ;;  %v1892_v60 = vld [vmem:[%s2516_s11 + $0x118] sm:$0xf0] }
  0xad   : > { %v1895_v6 = vor.u32 %v2236_v59, %v1892_v60  ;;  %v2244_v60 = vld [vmem:[%s2516_s11 + $0x14c] sm:$0xf] }
  0xaf   : > { %1240 = vmatmul.bf16.gmra.mxu3 %v1831_v63  ;;  %v2666_v1 = vpop.f32.mrf.mxu2 }
  0xb1   : > { %v2670_v3 = vpop.f32.mrf.mxu1 }
  0xb2   : > { %v2668_v2 = vpop.f32.mrf.mxu3 }
  0xb3   : > { %v956_v7 = vpop.f32.mrf.mxu0 }
  0xb7   : > { %v2681_v11 = vpop.f32.mrf.mxu2 }
  0xb9   : > { %v2685_v15 = vpop.f32.mrf.mxu1 }
  0xba   : > { %v2683_v12 = vpop.f32.mrf.mxu3 }
  0xbc   : > { %1067 = vmatmul.bf16.gmra.mxu1 %v1839_v13  ;;  %1156 = vmatmul.bf16.gmra.mxu2 %v1843_v14  ;;  %v959_v14 = vpop.f32.mrf.mxu0 }
  0xbf   : > { %1245 = vmatmul.bf16.gmra.mxu3 %v1847_v16  ;;  %v2690_v18 = vpop.f32.mrf.mxu2  ;;  %v2239_v16 = vld [vmem:[%s2516_s11 + $0x124] sm:$0xf] }
  0xc1   : > { %v2694_v20 = vpop.f32.mrf.mxu1 }
  0xc2   : > { %v2692_v19 = vpop.f32.mrf.mxu3 }
  0xc4   : > { %v961_v43 = vpop.f32.mrf.mxu0 }
  0xc7   : > { %v2705_v28 = vpop.f32.mrf.mxu2 }
  0xc9   : > { %v2709_v32 = vpop.f32.mrf.mxu1 }
  0xca   : > { %v2707_v29 = vpop.f32.mrf.mxu3 }
  0xcc   : > { %1072 = vmatmul.bf16.gmra.mxu1 %v1855_v30  ;;  %1161 = vmatmul.bf16.gmra.mxu2 %v1859_v31 }
  0xcf   : > { %1250 = vmatmul.bf16.gmra.mxu3 %v1863_v33  ;;  %v2714_v35 = vpop.f32.mrf.mxu2  ;;  %v1903_v33 = vor.u32 %v2239_v16, %v1900_v17 }
  0xd1   : > { %v2718_v37 = vpop.f32.mrf.mxu1 }
  0xd2   : > { %v2716_v36 = vpop.f32.mrf.mxu3 }
  0xd7   : > { %v2729_v45 = vpop.f32.mrf.mxu2 }
  0xd9   : > { %v2733_v49 = vpop.f32.mrf.mxu1 }
  0xda   : > { %v2731_v46 = vpop.f32.mrf.mxu3 }
  0xdc   : > { %1077 = vmatmul.bf16.gmra.mxu1 %v1871_v47  ;;  %1166 = vmatmul.bf16.gmra.mxu2 %v1875_v48 }
  0xdf   : > { %1255 = vmatmul.bf16.gmra.mxu3 %v1879_v50  ;;  %v2735_v51 = vpop.f32.mrf.mxu2 }
  0xe1   : > { %v2739_v54 = vpop.f32.mrf.mxu1 }
  0xe2   : > { %v2737_v53 = vpop.f32.mrf.mxu3 }
  0xe7   : > { %v2747_v61 = vpop.f32.mrf.mxu2 }
  0xe9   : > { %v1043_v5 = vpop.f32.mrf.mxu1 }
  0xea   : > { %v2749_v63 = vpop.f32.mrf.mxu3  ;;  %v1044_v13 = vadd.f32 %v1043_v5, %v954_v52  ;;  %v2243_v52 = vld [vmem:[%s2516_s11 + $0x144] sm:$0xf] }
  0xec   : > { %1082 = vmatmul.bf16.gmra.mxu1 %v1887_v0  ;;  %1171 = vmatmul.bf16.gmra.mxu2 %v1891_v4  ;;  %v1924_v0 = vld [vmem:[%s2516_s11 + $0x158] sm:$0xf0]  ;;  %v964_v4 = vpop.f32.mrf.mxu0 }
  0xef   : > { %1260 = vmatmul.bf16.gmra.mxu3 %v1895_v6  ;;  %v1132_v8 = vpop.f32.mrf.mxu2 }
  0xf0   : > { %v1133_v23 = vadd.f32 %v1132_v8, %v1044_v13  ;;  %v1919_v8 = vor.u32 %v2243_v52, %v1916_v55  ;;  %v1927_v13 = vor.u32 %v2244_v60, %v1924_v0  ;;  %v2251_v0 = vld [vmem:[%s2516_s11 + $0x184] sm:$0xf] }
  0xf1   : > { %v1045_v10 = vpop.f32.mrf.mxu1 }
  0xf2   : > { %v1221_v9 = vpop.f32.mrf.mxu3  ;;  %v1046_v24 = vadd.f32 %v1045_v10, %v956_v7 }
  0xf3   : > { %v1222_v40 = vadd.f32 %v1221_v9, %v1133_v23  ;;  %v1923_v9 = vor.u32 %v2246_v57, %v1922_v56 }
  0xf4   : > { %v966_v23 = vpop.f32.mrf.mxu0 }
  0xf7   : > { %v1134_v27 = vpop.f32.mrf.mxu2 }
  0xf8   : > { %v1135_v30 = vadd.f32 %v1134_v27, %v1046_v24  ;;  %v1932_v27 = vld [vmem:[%s2516_s11 + $0x170] sm:$0xf0] }
  0xf9   : > { %v1048_v38 = vpop.f32.mrf.mxu1 }
  0xfa   : > { %v1223_v31 = vpop.f32.mrf.mxu3  ;;  %v1049_v50 = vadd.f32 %v1048_v38, %v959_v14  ;;  %v2248_v38 = vld [vmem:[%s2516_s11 + $0x16c] sm:$0xf] }
  0xfb   : > { %v1224_v41 = vadd.f32 %v1223_v31, %v1135_v30  ;;  %v1938_v30 = vld [vmem:[%s2516_s11 + $0x168] sm:$0xf]  ;;  %v2250_v31 = vld [vmem:[%s2516_s11 + $0x174] sm:$0xf0] }
  0xfc   : > { %1087 = vmatmul.bf16.gmra.mxu1 %v1903_v33  ;;  %1176 = vmatmul.bf16.gmra.mxu2 %v1907_v34  ;;  %v969_v55 = vpop.f32.mrf.mxu0 }
  0xfd   : > { %v1400_v42 = vpack.c.bf16 %v1224_v41, %v1222_v40 }
  0xff   : > { %1265 = vmatmul.bf16.gmra.mxu3 %v1911_v39  ;;  %1492 = vmatmul.bf16.vlgmr.msrb.gmra.mxu0 %v1400_v42  ;;  %v1137_v44 = vpop.f32.mrf.mxu2  ;;  %v1940_v39 = vld [vmem:[%s2516_s11 + $0x178] sm:$0xf0] }
 0x100   : > { %v1138_v58 = vadd.f32 %v1137_v44, %v1049_v50  ;;  %v1939_v44 = vor.u32 %v2250_v31, %v1938_v30 }
 0x101   : > { %v1050_v48 = vpop.f32.mrf.mxu1 }
 0x102   : > { %v1226_v47 = vpop.f32.mrf.mxu3  ;;  %v1051_v59 = vadd.f32 %v1050_v48, %v961_v43  ;;  %v1935_v43 = vor.u32 %v2247_v26, %v1932_v27  ;;  %v1943_v48 = vor.u32 %v2248_v38, %v1940_v39  ;;  %v2255_v38 = vld [vmem:[%s2516_s11 + $0x1a4] sm:$0xf]  ;;  %v1964_v39 = vld [vmem:[%s2516_s11 + $0x1b0] sm:$0xf0] }
 0x103   : > { %v1227_v14 = vadd.f32 %v1226_v47, %v1138_v58 }
 0x107   : > { %v1139_v5 = vpop.f32.mrf.mxu2 }
 0x108   : > { %v1140_v6 = vadd.f32 %v1139_v5, %v1051_v59  ;;  %v1948_v5 = vld [vmem:[%s2516_s11 + $0x190] sm:$0xf0] }
 0x109   : > { %v1053_v10 = vpop.f32.mrf.mxu1 }
 0x10a   : > { %v1228_v7 = vpop.f32.mrf.mxu3  ;;  %v1054_v25 = vadd.f32 %v1053_v10, %v964_v4  ;;  %v971_v4 = vpop.f32.mrf.mxu0  ;;  %v2252_v10 = vld [vmem:[%s2516_s11 + $0x18c] sm:$0xf] }
 0x10b   : > { %v1229_v16 = vadd.f32 %v1228_v7, %v1140_v6  ;;  %v1954_v6 = vld [vmem:[%s2516_s11 + $0x188] sm:$0xf]  ;;  %v2254_v7 = vld [vmem:[%s2516_s11 + $0x194] sm:$0xf0] }
 0x10c   : > { %1092 = vmatmul.bf16.gmra.mxu1 %v1919_v8  ;;  %1181 = vmatmul.bf16.gmra.mxu2 %v1923_v9 }
 0x10d   : > { %v1401_v17 = vpack.c.bf16 %v1229_v16, %v1227_v14 }
 0x10f   : > { %1270 = vmatmul.bf16.gmra.mxu3 %v1927_v13  ;;  %1497 = vmatmul.bf16.gmra.mxu0 %v1401_v17  ;;  %v1142_v21 = vpop.f32.mrf.mxu2  ;;  %v1956_v13 = vld [vmem:[%s2516_s11 + $0x198] sm:$0xf0] }
 0x110   : > { %v1143_v33 = vadd.f32 %v1142_v21, %v1054_v25  ;;  %v1951_v21 = vor.u32 %v2251_v0, %v1948_v5 }
 0x111   : > { %v1055_v24 = vpop.f32.mrf.mxu1 }
 0x112   : > { %v1231_v22 = vpop.f32.mrf.mxu3  ;;  %v1056_v34 = vadd.f32 %v1055_v24, %v966_v23  ;;  %v1959_v24 = vor.u32 %v2252_v10, %v1956_v13 }
 0x113   : > { %v1232_v50 = vadd.f32 %v1231_v22, %v1143_v33  ;;  %v1955_v22 = vor.u32 %v2254_v7, %v1954_v6  ;;  %v2259_v6 = vld [vmem:[%s2516_s11 + $0x1c4] sm:$0xf]  ;;  %v1980_v7 = vld [vmem:[%s2516_s11 + $0x1d0] sm:$0xf0] }
 0x117   : > { %v1144_v40 = vpop.f32.mrf.mxu2 }
 0x118   : > { %v1145_v41 = vadd.f32 %v1144_v40, %v1056_v34  ;;  %v1970_v40 = vld [vmem:[%s2516_s11 + $0x1a8] sm:$0xf] }
 0x119   : > { %v1058_v47 = vpop.f32.mrf.mxu1 }
 0x11a   : > { %v1233_v42 = vpop.f32.mrf.mxu3  ;;  %v1059_v60 = vadd.f32 %v1058_v47, %v969_v55  ;;  %v1972_v47 = vld [vmem:[%s2516_s11 + $0x1b8] sm:$0xf0]  ;;  %v1967_v55 = vor.u32 %v2255_v38, %v1964_v39  ;;  %v2263_v38 = vld [vmem:[%s2516_s11 + $0x1e4] sm:$0xf]  ;;  %v1996_v39 = vld [vmem:[%s2516_s11 + $0x1f0] sm:$0xf0] }
 0x11b   : > { %v1234_v52 = vadd.f32 %v1233_v42, %v1145_v41  ;;  %v2258_v41 = vld [vmem:[%s2516_s11 + $0x1b4] sm:$0xf0] }
 0x11c   : > { %1097 = vmatmul.bf16.gmra.mxu1 %v1935_v43  ;;  %1186 = vmatmul.bf16.gmra.mxu2 %v1939_v44  ;;  %v2256_v44 = vld [vmem:[%s2516_s11 + $0x1ac] sm:$0xf] }
 0x11d   : > { %v1402_v56 = vpack.c.bf16 %v1234_v52, %v1232_v50 }
 0x11f   : > { %1275 = vmatmul.bf16.gmra.mxu3 %v1943_v48  ;;  %1502 = vmatmul.bf16.gmra.mxu0 %v1402_v56  ;;  %v1147_v57 = vpop.f32.mrf.mxu2  ;;  %v1971_v56 = vor.u32 %v2258_v41, %v1970_v40  ;;  %v2002_v40 = vld [vmem:[%s2516_s11 + $0x1e8] sm:$0xf]  ;;  %v2266_v41 = vld [vmem:[%s2516_s11 + $0x1f4] sm:$0xf0] }
 0x120   : > { %v1148_v8 = vadd.f32 %v1147_v57, %v1059_v60 }
 0x121   : > { %v1060_v59 = vpop.f32.mrf.mxu1 }
 0x122   : > { %v1236_v58 = vpop.f32.mrf.mxu3  ;;  %v1061_v9 = vadd.f32 %v1060_v59, %v971_v4 }
 0x123   : > { %v1237_v25 = vadd.f32 %v1236_v58, %v1148_v8  ;;  %v1986_v8 = vld [vmem:[%s2516_s11 + $0x1c8] sm:$0xf] }
 0x127   : > { %v1149_v14 = vpop.f32.mrf.mxu2 }
 0x128   : > { %v1150_v16 = vadd.f32 %v1149_v14, %v1061_v9  ;;  %v2262_v9 = vld [vmem:[%s2516_s11 + $0x1d4] sm:$0xf0]  ;;  %v2260_v14 = vld [vmem:[%s2516_s11 + $0x1cc] sm:$0xf] }
 0x129   : > { %v1063_v23 = vpop.f32.mrf.mxu1 }
 0x12a   : > { %v1238_v17 = vpop.f32.mrf.mxu3  ;;  %v1064_v34 = vadd.f32 %v1063_v23, %v2661_v62  ;;  %v1975_v62 = vor.u32 %v2256_v44, %v1972_v47  ;;  %v1983_v23 = vor.u32 %v2259_v6, %v1980_v7  ;;  %v2264_v44 = vld [vmem:[%s2516_s11 + $0x1ec] sm:$0xf]  ;;  %v2004_v47 = vld [vmem:[%s2516_s11 + $0x1f8] sm:$0xf0] }
 0x12b   : > { %v1239_v26 = vadd.f32 %v1238_v17, %v1150_v16  ;;  %v1988_v16 = vld [vmem:[%s2516_s11 + $0x1d8] sm:$0xf0] }
 0x12c   : > { %1102 = vmatmul.bf16.gmra.mxu1 %v1951_v21  ;;  %1191 = vmatmul.bf16.gmra.mxu2 %v1955_v22 }
 0x12d   : > { %v1403_v27 = vpack.c.bf16 %v1239_v26, %v1237_v25 }
 0x12f   : > { %1280 = vmatmul.bf16.gmra.mxu3 %v1959_v24  ;;  %1507 = vmatmul.bf16.gmra.mxu0 %v1403_v27  ;;  %v1152_v30 = vpop.f32.mrf.mxu2  ;;  %v1987_v24 = vor.u32 %v2262_v9, %v1986_v8 }
 0x130   : > { %v1153_v42 = vadd.f32 %v1152_v30, %v1064_v34 }
 0x131   : > { %v1065_v33 = vpop.f32.mrf.mxu1 }
 0x132   : > { %v1241_v31 = vpop.f32.mrf.mxu3  ;;  %v1066_v43 = vadd.f32 %v1065_v33, %v2670_v3 }
 0x133   : > { %v1242_v58 = vadd.f32 %v1241_v31, %v1153_v42 }
 0x137   : > { %v1154_v48 = vpop.f32.mrf.mxu2 }
 0x138   : > { %v1155_v50 = vadd.f32 %v1154_v48, %v1066_v43 }
 0x139   : > { %v1068_v57 = vpop.f32.mrf.mxu1 }
 0x13a   : > { %v1243_v52 = vpop.f32.mrf.mxu3  ;;  %v1069_v5 = vadd.f32 %v1068_v57, %v2685_v15  ;;  %v1991_v15 = vor.u32 %v2260_v14, %v1988_v16 }
 0x13b   : > { %v1244_v59 = vadd.f32 %v1243_v52, %v1155_v50 }
 0x13c   : > { %1107 = vmatmul.bf16.gmra.mxu1 %v1967_v55  ;;  %1196 = vmatmul.bf16.gmra.mxu2 %v1971_v56  ;;  %v1999_v55 = vor.u32 %v2263_v38, %v1996_v39  ;;  %v2003_v56 = vor.u32 %v2266_v41, %v2002_v40 }
 0x13d   : > { %v1404_v3 = vpack.c.bf16 %v1244_v59, %v1242_v58 }
 0x13f   : > { %1285 = vmatmul.bf16.gmra.mxu3 %v1975_v62  ;;  %1512 = vmatmul.bf16.gmra.mxu0 %v1404_v3  ;;  %v1157_v60 = vpop.f32.mrf.mxu2  ;;  %v2007_v62 = vor.u32 %v2264_v44, %v2004_v47 }
 0x140   : > { %v1158_v10 = vadd.f32 %v1157_v60, %v1069_v5 }
 0x141   : > { %v1070_v4 = vpop.f32.mrf.mxu1 }
 0x142   : > { %v1246_v0 = vpop.f32.mrf.mxu3  ;;  %v1071_v13 = vadd.f32 %v1070_v4, %v2694_v20 }
 0x143   : > { %v1247_v26 = vadd.f32 %v1246_v0, %v1158_v10 }
 0x147   : > { %v1159_v17 = vpop.f32.mrf.mxu2 }
 0x148   : > { %v1160_v21 = vadd.f32 %v1159_v17, %v1071_v13 }
 0x149   : > { %v1073_v25 = vpop.f32.mrf.mxu1 }
 0x14a   : > { %v1248_v22 = vpop.f32.mrf.mxu3  ;;  %v1074_v34 = vadd.f32 %v1073_v25, %v2709_v32 }
 0x14b   : > { %v1249_v27 = vadd.f32 %v1248_v22, %v1160_v21 }
 0x14c   : > { %1112 = vmatmul.bf16.gmra.mxu1 %v1983_v23  ;;  %1201 = vmatmul.bf16.gmra.mxu2 %v1987_v24 }
 0x14d   : > { %v1405_v20 = vpack.c.bf16 %v1249_v27, %v1247_v26 }
 0x14f   : > { %1290 = vmatmul.bf16.gmra.mxu3 %v1991_v15  ;;  %1517 = vmatmul.bf16.gmra.mxu0 %v1405_v20  ;;  %v1162_v30 = vpop.f32.mrf.mxu2 }
 0x150   : > { %v1163_v42 = vadd.f32 %v1162_v30, %v1074_v34 }
 0x151   : > { %v1075_v33 = vpop.f32.mrf.mxu1 }
 0x152   : > { %v1251_v31 = vpop.f32.mrf.mxu3  ;;  %v1076_v43 = vadd.f32 %v1075_v33, %v2718_v37 }
 0x153   : > { %v1252_v58 = vadd.f32 %v1251_v31, %v1163_v42  ;;  %v2806_v31 = vld [vmem:[%s2888_s3] ss:$0 sm:$0xff] }
 0x157   : > { %v1164_v48 = vpop.f32.mrf.mxu2 }
 0x158   : > { %v1165_v50 = vadd.f32 %v1164_v48, %v1076_v43 }
 0x159   : > { %v1078_v57 = vpop.f32.mrf.mxu1 }
 0x15a   : > { %v1253_v52 = vpop.f32.mrf.mxu3  ;;  %v1079_v37 = vadd.f32 %v1078_v57, %v2733_v49 }
 0x15b   : > { %v1254_v59 = vadd.f32 %v1253_v52, %v1165_v50 }
 0x15c   : > { %1117 = vmatmul.bf16.gmra.mxu1 %v1999_v55  ;;  %1206 = vmatmul.bf16.gmra.mxu2 %v2003_v56 }
 0x15d   : > { %v1406_v32 = vpack.c.bf16 %v1254_v59, %v1252_v58 }
 0x15f   : > { %1295 = vmatmul.bf16.gmra.mxu3 %v2007_v62  ;;  %1522 = vmatmul.bf16.gmra.mxu0 %v1406_v32  ;;  %v1167_v3 = vpop.f32.mrf.mxu2 }
 0x160   : > { %v1168_v4 = vadd.f32 %v1167_v3, %v1079_v37 }
 0x161   : > { %v1080_v0 = vpop.f32.mrf.mxu1 }
 0x162   : > { %v1256_v60 = vpop.f32.mrf.mxu3  ;;  %v1081_v5 = vadd.f32 %v1080_v0, %v2739_v54 }
 0x163   : > { %v1257_v10 = vadd.f32 %v1256_v60, %v1168_v4 }
 0x167   : > { %v1169_v6 = vpop.f32.mrf.mxu2 }
 0x168   : > { %v1170_v7 = vadd.f32 %v1169_v6, %v1081_v5 }
 0x169   : > { %v1083_v9 = vpop.f32.mrf.mxu1 }
 0x16a   : > { %v1258_v8 = vpop.f32.mrf.mxu3  ;;  %v1084_v22 = vadd.f32 %v1083_v9, %v2666_v1 }
 0x16b   : > { %v1259_v13 = vadd.f32 %v1258_v8, %v1170_v7 }
 0x16d   : > { %v1407_v14 = vpack.c.bf16 %v1259_v13, %v1257_v10 }
 0x16f   : > { %1527 = vmatmul.bf16.gmra.mxu0 %v1407_v14  ;;  %v1172_v16 = vpop.f32.mrf.mxu2 }
 0x170   : > { %v1173_v23 = vadd.f32 %v1172_v16, %v1084_v22 }
 0x171   : > { %v1085_v21 = vpop.f32.mrf.mxu1 }
 0x172   : > { %v1261_v17 = vpop.f32.mrf.mxu3  ;;  %v1086_v24 = vadd.f32 %v1085_v21, %v2681_v11 }
 0x173   : > { %v1262_v26 = vadd.f32 %v1261_v17, %v1173_v23 }
 0x177   : > { %v1174_v49 = vpop.f32.mrf.mxu2 }
 0x178   : > { %v1175_v25 = vadd.f32 %v1174_v49, %v1086_v24 }
 0x179   : > { %v1088_v15 = vpop.f32.mrf.mxu1 }
 0x17a   : > { %v1263_v54 = vpop.f32.mrf.mxu3  ;;  %v1089_v39 = vadd.f32 %v1088_v15, %v2690_v18 }
 0x17b   : > { %v1264_v27 = vadd.f32 %v1263_v54, %v1175_v25 }
 0x17c   : > { %v1493_v20 = vpop.f32.mrf.mxu0 }
 0x17d   : > { %v1408_v30 = vpack.c.bf16 %v1264_v27, %v1262_v26  ;;  %v1494_v11 = vadd.f32 %v2806_v31, %v1493_v20 }
 0x17f   : > { %1532 = vmatmul.bf16.gmra.mxu0 %v1408_v30  ;;  %v1177_v33 = vpop.f32.mrf.mxu2  ;;  %v1573_v41 = vmax.f32 %v1494_v11, 0.0 }
 0x180   : > { %v1178_v42 = vadd.f32 %v1177_v33, %v1089_v39 }
 0x181   : > { %v1090_v34 = vpop.f32.mrf.mxu1 }
 0x182   : > { %v1266_v1 = vpop.f32.mrf.mxu3  ;;  %v1091_v43 = vadd.f32 %v1090_v34, %v2705_v28 }
 0x183   : > { %v1267_v18 = vadd.f32 %v1266_v1, %v1178_v42 }
 0x184   : > { %v1495_v38 = vpop.f32.mrf.mxu0 }
 0x185   : > { %v1496_v40 = vadd.f32 %v2806_v31, %v1495_v38 }
 0x187   : > { %v1574_v44 = vmax.f32 %v1496_v40, 0.0  ;;  %v1179_v47 = vpop.f32.mrf.mxu2 }
 0x188   : > { %v1180_v50 = vadd.f32 %v1179_v47, %v1091_v43 }
 0x189   : > { %v2278_v48 = vpack.c.bf16 %v1574_v44, %v1573_v41  ;;  %v1093_v55 = vpop.f32.mrf.mxu1 }
 0x18a   : > { %v1268_v52 = vpop.f32.mrf.mxu3  ;;  %v1094_v60 = vadd.f32 %v1093_v55, %v2714_v35 }
 0x18b   : > { %2279 = vst [vmem:[%s2816_s22] sm:$0xff] %v2278_v48   ;;  %v1269_v56 = vadd.f32 %v1268_v52, %v1180_v50 }
 0x18c   : > { %v1498_v57 = vpop.f32.mrf.mxu0 }
 0x18d   : > { %v1409_v62 = vpack.c.bf16 %v1269_v56, %v1267_v18  ;;  %v1499_v32 = vadd.f32 %v2806_v31, %v1498_v57 }
 0x18f   : > { %1537 = vmatmul.bf16.gmra.mxu0 %v1409_v62  ;;  %v1182_v58 = vpop.f32.mrf.mxu2  ;;  %v1575_v37 = vmax.f32 %v1499_v32, 0.0 }
 0x190   : > { %v1183_v4 = vadd.f32 %v1182_v58, %v1094_v60 }
 0x191   : > { %v1095_v59 = vpop.f32.mrf.mxu1 }
 0x192   : > { %v1271_v28 = vpop.f32.mrf.mxu3  ;;  %v1096_v5 = vadd.f32 %v1095_v59, %v2729_v45 }
 0x193   : > { %v1272_v14 = vadd.f32 %v1271_v28, %v1183_v4 }
 0x194   : > { %v1500_v3 = vpop.f32.mrf.mxu0 }
 0x195   : > { %v1501_v0 = vadd.f32 %v2806_v31, %v1500_v3 }
 0x197   : > { %v1576_v6 = vmax.f32 %v1501_v0, 0.0  ;;  %v1184_v7 = vpop.f32.mrf.mxu2 }
 0x198   : > { %v1185_v9 = vadd.f32 %v1184_v7, %v1096_v5 }
 0x199   : > { %v2283_v8 = vpack.c.bf16 %v1576_v6, %v1575_v37  ;;  %v1098_v13 = vpop.f32.mrf.mxu1 }
 0x19a   : > { %v1273_v10 = vpop.f32.mrf.mxu3  ;;  %v1099_v45 = vadd.f32 %v1098_v13, %v2735_v51 }
 0x19b   : > { %2355 = vst [vmem:[%s2816_s22 + $0x8] sm:$0xff] %v2283_v8   ;;  %v1274_v16 = vadd.f32 %v1273_v10, %v1185_v9 }
 0x19c   : > { %v1503_v17 = vpop.f32.mrf.mxu0 }
 0x19d   : > { %v1410_v21 = vpack.c.bf16 %v1274_v16, %v1272_v14  ;;  %v1504_v24 = vadd.f32 %v2806_v31, %v1503_v17 }
 0x19f   : > { %1542 = vmatmul.bf16.gmra.mxu0 %v1410_v21  ;;  %v1187_v22 = vpop.f32.mrf.mxu2  ;;  %v1577_v54 = vmax.f32 %v1504_v24, 0.0 }
 0x1a0   : > { %v1188_v15 = vadd.f32 %v1187_v22, %v1099_v45 }
 0x1a1   : > { %v1100_v23 = vpop.f32.mrf.mxu1 }
 0x1a2   : > { %v1276_v35 = vpop.f32.mrf.mxu3  ;;  %v1101_v26 = vadd.f32 %v1100_v23, %v2747_v61 }
 0x1a3   : > { %v1277_v11 = vadd.f32 %v1276_v35, %v1188_v15 }
 0x1a4   : > { %v1505_v49 = vpop.f32.mrf.mxu0 }
 0x1a5   : > { %v1506_v25 = vadd.f32 %v2806_v31, %v1505_v49 }
 0x1a7   : > { %v1578_v27 = vmax.f32 %v1506_v25, 0.0  ;;  %v1189_v20 = vpop.f32.mrf.mxu2 }
 0x1a8   : > { %v1190_v33 = vadd.f32 %v1189_v20, %v1101_v26 }
 0x1a9   : > { %v2288_v30 = vpack.c.bf16 %v1578_v27, %v1577_v54  ;;  %v1103_v34 = vpop.f32.mrf.mxu1 }
 0x1aa   : > { %v1278_v1 = vpop.f32.mrf.mxu3  ;;  %v1104_v61 = vadd.f32 %v1103_v34, %v2668_v2 }
 0x1ab   : > { %2356 = vst [vmem:[%s2816_s22 + $0x10] sm:$0xff] %v2288_v30   ;;  %v1279_v38 = vadd.f32 %v1278_v1, %v1190_v33 }
 0x1ac   : > { %v1508_v39 = vpop.f32.mrf.mxu0 }
 0x1ad   : > { %v1411_v40 = vpack.c.bf16 %v1279_v38, %v1277_v11  ;;  %v1509_v43 = vadd.f32 %v2806_v31, %v1508_v39 }
 0x1af   : > { %1547 = vmatmul.bf16.gmra.mxu0 %v1411_v40  ;;  %v1192_v41 = vpop.f32.mrf.mxu2  ;;  %v1579_v48 = vmax.f32 %v1509_v43, 0.0 }
 0x1b0   : > { %v1193_v50 = vadd.f32 %v1192_v41, %v1104_v61 }
 0x1b1   : > { %v1105_v42 = vpop.f32.mrf.mxu1 }
 0x1b2   : > { %v1281_v51 = vpop.f32.mrf.mxu3  ;;  %v1106_v52 = vadd.f32 %v1105_v42, %v2683_v12 }
 0x1b3   : > { %v1282_v28 = vadd.f32 %v1281_v51, %v1193_v50 }
 0x1b4   : > { %v1510_v44 = vpop.f32.mrf.mxu0 }
 0x1b5   : > { %v1511_v47 = vadd.f32 %v2806_v31, %v1510_v44 }
 0x1b7   : > { %v1580_v55 = vmax.f32 %v1511_v47, 0.0  ;;  %v1194_v18 = vpop.f32.mrf.mxu2 }
 0x1b8   : > { %v1195_v57 = vadd.f32 %v1194_v18, %v1106_v52 }
 0x1b9   : > { %v2293_v56 = vpack.c.bf16 %v1580_v55, %v1579_v48  ;;  %v1108_v58 = vpop.f32.mrf.mxu1 }
 0x1ba   : > { %v1283_v62 = vpop.f32.mrf.mxu3  ;;  %v1109_v12 = vadd.f32 %v1108_v58, %v2692_v19 }
 0x1bb   : > { %2357 = vst [vmem:[%s2816_s22 + $0x18] sm:$0xff] %v2293_v56   ;;  %v1284_v59 = vadd.f32 %v1283_v62, %v1195_v57 }
 0x1bc   : > { %v1513_v32 = vpop.f32.mrf.mxu0 }
 0x1bd   : > { %v1412_v3 = vpack.c.bf16 %v1284_v59, %v1282_v28  ;;  %v1514_v37 = vadd.f32 %v2806_v31, %v1513_v32 }
 0x1bf   : > { %1552 = vmatmul.bf16.gmra.mxu0 %v1412_v3  ;;  %v1197_v60 = vpop.f32.mrf.mxu2  ;;  %v1581_v6 = vmax.f32 %v1514_v37, 0.0 }
 0x1c0   : > { %v1198_v7 = vadd.f32 %v1197_v60, %v1109_v12 }
 0x1c1   : > { %v1110_v0 = vpop.f32.mrf.mxu1 }
 0x1c2   : > { %v1286_v2 = vpop.f32.mrf.mxu3  ;;  %v1111_v8 = vadd.f32 %v1110_v0, %v2707_v29 }
 0x1c3   : > { %v1287_v21 = vadd.f32 %v1286_v2, %v1198_v7 }
 0x1c4   : > { %v1515_v4 = vpop.f32.mrf.mxu0 }
 0x1c5   : > { %v1516_v5 = vadd.f32 %v2806_v31, %v1515_v4 }
 0x1c7   : > { %v1582_v9 = vmax.f32 %v1516_v5, 0.0  ;;  %v1199_v10 = vpop.f32.mrf.mxu2 }
 0x1c8   : > { %v1200_v14 = vadd.f32 %v1199_v10, %v1111_v8 }
 0x1c9   : > { %v2298_v13 = vpack.c.bf16 %v1582_v9, %v1581_v6  ;;  %v1113_v17 = vpop.f32.mrf.mxu1 }
 0x1ca   : > { %v1288_v16 = vpop.f32.mrf.mxu3  ;;  %v1114_v29 = vadd.f32 %v1113_v17, %v2716_v36 }
 0x1cb   : > { %2358 = vst [vmem:[%s2816_s22 + $0x20] sm:$0xff] %v2298_v13   ;;  %v1289_v22 = vadd.f32 %v1288_v16, %v1200_v14 }
 0x1cc   : > { %v1518_v35 = vpop.f32.mrf.mxu0 }
 0x1cd   : > { %v1413_v23 = vpack.c.bf16 %v1289_v22, %v1287_v21  ;;  %v1519_v45 = vadd.f32 %v2806_v31, %v1518_v35 }
 0x1cf   : > { %1557 = vmatmul.bf16.gmra.mxu0 %v1413_v23  ;;  %v1202_v24 = vpop.f32.mrf.mxu2  ;;  %v1583_v15 = vmax.f32 %v1519_v45, 0.0 }
 0x1d0   : > { %v1203_v26 = vadd.f32 %v1202_v24, %v1114_v29 }
 0x1d1   : > { %v1115_v49 = vpop.f32.mrf.mxu1 }
 0x1d2   : > { %v1291_v19 = vpop.f32.mrf.mxu3  ;;  %v1116_v27 = vadd.f32 %v1115_v49, %v2731_v46 }
 0x1d3   : > { %v1292_v38 = vadd.f32 %v1291_v19, %v1203_v26 }
 0x1d4   : > { %v1520_v25 = vpop.f32.mrf.mxu0 }
 0x1d5   : > { %v1521_v54 = vadd.f32 %v2806_v31, %v1520_v25 }
 0x1d7   : > { %v1584_v20 = vmax.f32 %v1521_v54, 0.0  ;;  %v1204_v30 = vpop.f32.mrf.mxu2 }
 0x1d8   : > { %v1205_v1 = vadd.f32 %v1204_v30, %v1116_v27 }
 0x1d9   : > { %v2303_v33 = vpack.c.bf16 %v1584_v20, %v1583_v15  ;;  %v1118_v11 = vpop.f32.mrf.mxu1 }
 0x1da   : > { %v1293_v34 = vpop.f32.mrf.mxu3  ;;  %v1119_v46 = vadd.f32 %v1118_v11, %v2737_v53 }
 0x1db   : > { %2359 = vst [vmem:[%s2816_s22 + $0x28] sm:$0xff] %v2303_v33   ;;  %v1294_v39 = vadd.f32 %v1293_v34, %v1205_v1 }
 0x1dc   : > { %v1523_v40 = vpop.f32.mrf.mxu0 }
 0x1dd   : > { %v1414_v41 = vpack.c.bf16 %v1294_v39, %v1292_v38  ;;  %v1524_v42 = vadd.f32 %v2806_v31, %v1523_v40 }
 0x1df   : > { %1562 = vmatmul.bf16.gmra.mxu0 %v1414_v41  ;;  %v1207_v51 = vpop.f32.mrf.mxu2  ;;  %v1585_v47 = vmax.f32 %v1524_v42, 0.0 }
 0x1e0   : > { %v1208_v48 = vadd.f32 %v1207_v51, %v1119_v46 }
 0x1e1   : > { %v1120_v43 = vpop.f32.mrf.mxu1 }
 0x1e2   : > { %v1296_v36 = vpop.f32.mrf.mxu3  ;;  %v1121_v50 = vadd.f32 %v1120_v43, %v2749_v63 }
 0x1e3   : > { %v1297_v62 = vadd.f32 %v1296_v36, %v1208_v48 }
 0x1e4   : > { %v1525_v44 = vpop.f32.mrf.mxu0 }
 0x1e5   : > { %v1526_v61 = vadd.f32 %v2806_v31, %v1525_v44 }
 0x1e7   : > { %v1586_v52 = vmax.f32 %v1526_v61, 0.0  ;;  %v1209_v55 = vpop.f32.mrf.mxu2 }
 0x1e8   : > { %v1210_v56 = vadd.f32 %v1209_v55, %v1121_v50 }
 0x1e9   : > { %v2308_v18 = vpack.c.bf16 %v1586_v52, %v1585_v47 }
 0x1ea   : > { %v1298_v57 = vpop.f32.mrf.mxu3 }
 0x1eb   : > { %2360 = vst [vmem:[%s2816_s22 + $0x30] sm:$0xff] %v2308_v18   ;;  %v1299_v58 = vadd.f32 %v1298_v57, %v1210_v56 }
 0x1ec   : > { %v1528_v28 = vpop.f32.mrf.mxu0 }
 0x1ed   : > { %v1415_v59 = vpack.c.bf16 %v1299_v58, %v1297_v62  ;;  %v1529_v53 = vadd.f32 %v2806_v31, %v1528_v28 }
 0x1ef   : > { %1567 = vmatmul.bf16.gmra.mxu0 %v1415_v59  ;;  %v1587_v60 = vmax.f32 %v1529_v53, 0.0 }
 0x1f4   : > { %v1530_v32 = vpop.f32.mrf.mxu0 }
 0x1f5   : > { %v1531_v3 = vadd.f32 %v2806_v31, %v1530_v32 }
 0x1f7   : > { %v1588_v63 = vmax.f32 %v1531_v3, 0.0 }
 0x1f9   : > { %v2313_v2 = vpack.c.bf16 %v1588_v63, %v1587_v60 }
 0x1fb   : > { %2361 = vst [vmem:[%s2816_s22 + $0x38] sm:$0xff] %v2313_v2  }
 0x1fc   : > { %v1533_v0 = vpop.f32.mrf.mxu0 }
 0x1fd   : > { %v1534_v37 = vadd.f32 %v2806_v31, %v1533_v0 }
 0x1ff   : > { %v1589_v5 = vmax.f32 %v1534_v37, 0.0 }
 0x204   : > { %v1535_v4 = vpop.f32.mrf.mxu0 }
 0x205   : > { %v1536_v12 = vadd.f32 %v2806_v31, %v1535_v4 }
 0x207   : > { %v1590_v6 = vmax.f32 %v1536_v12, 0.0 }
 0x209   : > { %v2318_v7 = vpack.c.bf16 %v1590_v6, %v1589_v5 }
 0x20b   : > { %2362 = vst [vmem:[%s2816_s22 + $0x40] sm:$0xff] %v2318_v7  }
 0x20c   : > { %v1538_v8 = vpop.f32.mrf.mxu0 }
 0x20d   : > { %v1539_v9 = vadd.f32 %v2806_v31, %v1538_v8 }
 0x20f   : > { %v1591_v14 = vmax.f32 %v1539_v9, 0.0 }
 0x214   : > { %v1540_v10 = vpop.f32.mrf.mxu0 }
 0x215   : > { %v1541_v13 = vadd.f32 %v2806_v31, %v1540_v10 }
 0x217   : > { %v1592_v16 = vmax.f32 %v1541_v13, 0.0 }
 0x219   : > { %v2323_v17 = vpack.c.bf16 %v1592_v16, %v1591_v14 }
 0x21b   : > { %2363 = vst [vmem:[%s2816_s22 + $0x48] sm:$0xff] %v2323_v17  }
 0x21c   : > { %v1543_v21 = vpop.f32.mrf.mxu0 }
 0x21d   : > { %v1544_v22 = vadd.f32 %v2806_v31, %v1543_v21 }
 0x21f   : > { %v1593_v24 = vmax.f32 %v1544_v22, 0.0 }
 0x224   : > { %v1545_v35 = vpop.f32.mrf.mxu0 }
 0x225   : > { %v1546_v23 = vadd.f32 %v2806_v31, %v1545_v35 }
 0x227   : > { %v1594_v19 = vmax.f32 %v1546_v23, 0.0 }
 0x229   : > { %v2328_v49 = vpack.c.bf16 %v1594_v19, %v1593_v24 }
 0x22b   : > { %2364 = vst [vmem:[%s2816_s22 + $0x50] sm:$0xff] %v2328_v49  }
 0x22c   : > { %v1548_v45 = vpop.f32.mrf.mxu0 }
 0x22d   : > { %v1549_v25 = vadd.f32 %v2806_v31, %v1548_v45 }
 0x22f   : > { %v1595_v15 = vmax.f32 %v1549_v25, 0.0 }
 0x234   : > { %v1550_v29 = vpop.f32.mrf.mxu0 }
 0x235   : > { %v1551_v54 = vadd.f32 %v2806_v31, %v1550_v29 }
 0x237   : > { %v1596_v26 = vmax.f32 %v1551_v54, 0.0 }
 0x239   : > { %v2333_v27 = vpack.c.bf16 %v1596_v26, %v1595_v15 }
 0x23b   : > { %2365 = vst [vmem:[%s2816_s22 + $0x58] sm:$0xff] %v2333_v27  }
 0x23c   : > { %v1553_v20 = vpop.f32.mrf.mxu0 }
 0x23d   : > { %v1554_v30 = vadd.f32 %v2806_v31, %v1553_v20 }
 0x23f   : > { %v1597_v34 = vmax.f32 %v1554_v30, 0.0 }
 0x244   : > { %v1555_v33 = vpop.f32.mrf.mxu0 }
 0x245   : > { %v1556_v1 = vadd.f32 %v2806_v31, %v1555_v33 }
 0x247   : > { %v1598_v11 = vmax.f32 %v1556_v1, 0.0 }
 0x249   : > { %v2338_v38 = vpack.c.bf16 %v1598_v11, %v1597_v34 }
 0x24b   : > { %2366 = vst [vmem:[%s2816_s22 + $0x60] sm:$0xff] %v2338_v38  }
 0x24c   : > { %v1558_v39 = vpop.f32.mrf.mxu0 }
 0x24d   : > { %v1559_v40 = vadd.f32 %v2806_v31, %v1558_v39 }
 0x24f   : > { %v1599_v36 = vmax.f32 %v1559_v40, 0.0 }
 0x254   : > { %v1560_v41 = vpop.f32.mrf.mxu0 }
 0x255   : > { %v1561_v51 = vadd.f32 %v2806_v31, %v1560_v41 }
 0x257   : > { %v1600_v42 = vmax.f32 %v1561_v51, 0.0 }
 0x259   : > { %v2343_v43 = vpack.c.bf16 %v1600_v42, %v1599_v36 }
 0x25b   : > { %2367 = vst [vmem:[%s2816_s22 + $0x68] sm:$0xff] %v2343_v43  }
 0x25c   : > { %v1563_v44 = vpop.f32.mrf.mxu0 }
 0x25d   : > { %v1564_v46 = vadd.f32 %v2806_v31, %v1563_v44 }
 0x25f   : > { %v1601_v48 = vmax.f32 %v1564_v46, 0.0 }
 0x264   : > { %v1565_v61 = vpop.f32.mrf.mxu0 }
 0x265   : > { %v1566_v47 = vadd.f32 %v2806_v31, %v1565_v61 }
 0x267   : > { %v1602_v50 = vmax.f32 %v1566_v47, 0.0 }
 0x269   : > { %v2348_v52 = vpack.c.bf16 %v1602_v50, %v1601_v48 }
 0x26b   : > { %2368 = vst [vmem:[%s2816_s22 + $0x70] sm:$0xff] %v2348_v52  }
 0x26c   : > { %v1568_v55 = vpop.f32.mrf.mxu0 }
 0x26d   : > { %v1569_v18 = vadd.f32 %v2806_v31, %v1568_v55 }
 0x26f   : > { %v1603_v62 = vmax.f32 %v1569_v18, 0.0 }
 0x274   : > { %v1570_v56 = vpop.f32.mrf.mxu0 }
 0x275   : > { %v1571_v57 = vadd.f32 %v2806_v31, %v1570_v56 }
 0x277   : > { %v1604_v58 = vmax.f32 %v1571_v57, 0.0 }
 0x279   : > { %v2353_v28 = vpack.c.bf16 %v1604_v58, %v1603_v62 }
 0x27b   : > { %2369 = vst [vmem:[%s2816_s22 + $0x78] sm:$0xff] %v2353_v28  }
 0x27c PF: > { %s14_s17 = sadd.s32 1, %s2441_s17   ;;  %s2890_s15 = smov %s2437_s16 }
 0x27d   : > { %p11_p5 = scmp.ge.s32.totalorder %s14_s17, 4   ;;  %s2891_s16 = smov %s2893_s18 }
 0x27f   :  { %13 = sbr.rel (!%p11_p5) target bundleno = 2 (0x2), region = 75 }

</bundles_post_ra>
